<compile_context>
chip_gen: v5e
topology: v5e:2x2
jax: 0.10.0
libtpu: 0.0.40
codegen_flags: <defaults>
</compile_context>

<pallas_src>
import jax
import jax.numpy as jnp
from jax.experimental import pallas as pl
from jax.experimental.pallas import tpu as pltpu

# ----------------------------- configuration -------------------------------
B, C, H, W = 2, 3, 8, 32        # batch, channels, height, width (post-resize)
K = 3                           # conv kernel size
COUT = 16                       # conv output channels (logical)
VOCAB = 32                      # vocab size (blank at index VOCAB-1)

LANES = 128                     # TPU vreg lane width
PATCH = K * K * C               # im2col contraction size (27)
PATCH_PAD = 128                 # im2col lanes padded to lane-dense width
COUT_PAD = 128                  # conv channels padded to lane-dense width
VOCAB_PAD = 128                 # vocab padded to lane-dense width
NEG_BIAS = -1e9                 # bias for padded vocab lanes (never win max)

ROWS = B * W * H                # 512 im2col rows, ordered (B, W, H), H minor
STEPS = B * W                   # 64 decode timesteps

MEAN = (0.694, 0.695, 0.693)    # doctr default normalization
STD = (0.299, 0.296, 0.301)


# ------------------------------ Pallas kernel -------------------------------
def recog_kernel(col_ref, wconv_ref, bconv_ref, wcls_ref, bcls_ref, out_ref):
    # col_ref:   [ROWS, PATCH_PAD] bf16 im2col rows ordered (B, W, H), H minor.
    # wconv_ref: [PATCH_PAD, COUT_PAD] bf16 stacked 3x3 conv weight.
    # 3x3 conv == ONE MXU matmul on the pre-built im2col slab, f32 accumulate.
    acc = jnp.dot(col_ref[...], wconv_ref[...],
                  preferred_element_type=jnp.float32)             # [ROWS, 128]
    feat = jnp.maximum(acc + bconv_ref[...], 0.0)                 # bias + ReLU

    # mean-pool over H: rows are (B, W, H) with H sublane-minor, so this is a
    # pure 8-row sublane-group reduction.  The 1/H scale is folded into w_cls.
    pooled = feat.reshape(STEPS, H, COUT_PAD).sum(axis=1)         # [STEPS, 128]

    # linear classifier over the (padded) vocabulary on the MXU (bf16 operands,
    # f32 accumulation); padded vocab lanes carry a -1e9 bias.
    logits = jnp.dot(pooled.astype(jnp.bfloat16), wcls_ref[...],
                     preferred_element_type=jnp.float32)          # [STEPS, 128]
    logits = logits + bcls_ref[...]

    # per-timestep softmax max-probability: exp(m - m) / sum = 1 / sum.
    m = jnp.max(logits, axis=-1, keepdims=True)                   # [STEPS, 1]
    s = jnp.sum(jnp.exp(logits - m), axis=-1, keepdims=True)      # [STEPS, 1]
    r = pl.reciprocal(s, approx=True)         # EUP slot (free-ish)
    p_max = r * (2.0 - s * r)                 # one Newton step -> f32 accuracy

    # argmax via iota + masked min (first-occurrence argmax; equality with the
    # just-computed f32 max is exact; padded lanes sit at -1e9 and never win).
    ids = jax.lax.broadcasted_iota(jnp.int32, logits.shape, 1)
    idx = jnp.min(jnp.where(logits == m, ids, VOCAB_PAD),
                  axis=-1, keepdims=True)                         # [STEPS, 1]

    # single merged lane-dense output slab: slab 0 = indices (exact as small
    # floats), slab 1 = per-step max softmax prob.  Unmasked 128-wide stores;
    # the host slices lane 0.
    out_ref[0] = jnp.broadcast_to(idx.astype(jnp.float32), (STEPS, LANES))
    out_ref[1] = jnp.broadcast_to(p_max, (STEPS, LANES))


# ------------------------------ JAX glue ------------------------------------
@jax.jit
def recognition_forward(crops_nchw, w_conv, b_conv, w_cls, b_cls):
    """normalize -> 3x3 conv -> ReLU -> H-pool -> classifier -> (idx, conf)."""
    mean = jnp.array(MEAN, jnp.float32).reshape(1, C, 1, 1)
    std = jnp.array(STD, jnp.float32).reshape(1, C, 1, 1)
    # Normalize BEFORE padding so zero-padded border pixels are exactly zero in
    # normalized space (matches reference normalize-then-zero-pad semantics).
    x = (crops_nchw.astype(jnp.float32) - mean) / std

    # NCHW -> [B, W, H, C] (H sublane-minor) and zero-pad for "same" 3x3 conv.
    x = jnp.transpose(x, (0, 3, 2, 1))
    x_pad = jnp.pad(x, ((0, 0), (1, 1), (1, 1), (0, 0)))          # [B,W+2,H+2,C]

    # Wrapper-side im2col: lane-dense (ROWS, 128) slab; taps ordered (kh,kw,c)
    # to match w_conv.reshape(K*K*C, COUT).  256 KiB of HBM: negligible.
    taps = [x_pad[:, kw:kw + W, kh:kh + H, :]
            for kh in range(K) for kw in range(K)]                # 9 x [B,W,H,C]
    col = jnp.stack(taps, axis=3).reshape(ROWS, PATCH)            # [ROWS, 27]
    col_pad = jnp.zeros((ROWS, PATCH_PAD), jnp.bfloat16)
    col_pad = col_pad.at[:, :PATCH].set(col.astype(jnp.bfloat16))

    # Pad / cast parameters to lane-dense bf16 MXU operands (biases stay f32).
    w_conv_p = jnp.zeros((PATCH_PAD, COUT_PAD), jnp.bfloat16)
    w_conv_p = w_conv_p.at[:PATCH, :COUT].set(
        w_conv.reshape(PATCH, COUT).astype(jnp.bfloat16))
    b_conv_p = jnp.zeros((1, COUT_PAD), jnp.float32).at[0, :COUT].set(b_conv)
    w_cls_p = jnp.zeros((COUT_PAD, VOCAB_PAD), jnp.bfloat16)
    w_cls_p = w_cls_p.at[:COUT, :VOCAB].set(
        (w_cls * (1.0 / H)).astype(jnp.bfloat16))     # fold mean-pool 1/H scale
    b_cls_p = jnp.full((1, VOCAB_PAD), NEG_BIAS, jnp.float32)
    b_cls_p = b_cls_p.at[0, :VOCAB].set(b_cls)

    # TODO(synk): at these toy shapes grid=(1,) on one TensorCore is enough;
    # when B*W*H grows, tile ROWS with a leading "parallel" grid axis (block
    # sized to v7x's 64 MiB VMEM) so both v7x TensorCores are used.
    out_slab = pl.pallas_call(
        recog_kernel,
        out_shape=jax.ShapeDtypeStruct((2, STEPS, LANES), jnp.float32),
        grid=(1,),
        in_specs=[
            pl.BlockSpec((ROWS, PATCH_PAD), lambda i: (0, 0)),
            pl.BlockSpec((PATCH_PAD, COUT_PAD), lambda i: (0, 0)),
            pl.BlockSpec((1, COUT_PAD), lambda i: (0, 0)),
            pl.BlockSpec((COUT_PAD, VOCAB_PAD), lambda i: (0, 0)),
            pl.BlockSpec((1, VOCAB_PAD), lambda i: (0, 0)),
        ],
        out_specs=pl.BlockSpec((2, STEPS, LANES), lambda i: (0, 0, 0)),
        compiler_params=pltpu.CompilerParams(
            dimension_semantics=("arbitrary",)),
    )(col_pad, w_conv_p, b_conv_p, w_cls_p, b_cls_p)

    # Slice the lane-dense slab back to logical shapes (tiny fused XLA ops).
    idx = out_slab[0, :, 0].astype(jnp.int32).reshape(B, W)       # [B, W]
    p_step = out_slab[1, :, 0].reshape(B, W)                      # [B, W]
    # sequence confidence = product over timesteps of max softmax prob (only
    # 64 scalars; kept as a fused XLA reduce outside the kernel).
    conf = jnp.prod(p_step, axis=1, keepdims=True)                # [B, 1]
    return idx, conf


def ctc_decode(idx, conf):
    """Host-side best-path decode -> list[tuple[str, float]] (mirrors module API)."""
    vocab = "abcdefghijklmnopqrstuvwxyz01234"      # VOCAB-1 characters
    blank = VOCAB - 1
    out = []
    for b in range(B):
        prev, chars = -1, []
        for s in [int(v) for v in idx[b]]:
            if s != prev and s != blank:
                chars.append(vocab[s])
            prev = s
        out.append(("".join(chars), float(conf[b, 0])))
    return out


# -------------------------------- main ---------------------------------------
if __name__ == "__main__":
    key = jax.random.PRNGKey(0)
    k1, k2, k3, k4, k5 = jax.random.split(key, 5)

    # deterministic synthetic model parameters
    w_conv = jax.random.normal(k1, (K, K, C, COUT), jnp.float32) * 0.1
    b_conv = jax.random.normal(k2, (COUT,), jnp.float32) * 0.01
    w_cls = jax.random.normal(k3, (COUT, VOCAB), jnp.float32) * 0.1
    b_cls = jax.random.normal(k4, (VOCAB,), jnp.float32) * 0.01

    # crops: already resized and batched, NCHW like the PyTorch pre_processor output
    crops = jax.random.uniform(k5, (B, C, H, W), jnp.float32)

    idx, conf = recognition_forward(crops, w_conv, b_conv, w_cls, b_cls)
    jax.block_until_ready((idx, conf))

    preds = ctc_decode(jax.device_get(idx), jax.device_get(conf))
    assert len(preds) == B and all(isinstance(p[0], str) for p in preds)
    print("KERNEL_OK")
</pallas_src>

<mosaic_0001>
module attributes {stable_mosaic.version = 11 : i64} {
  func.func @recog_kernel(%arg0: i32, %arg1: memref<512x128xbf16, #tpu.memory_space<vmem>>, %arg2: memref<128x128xbf16, #tpu.memory_space<vmem>>, %arg3: memref<1x128xf32, #tpu.memory_space<vmem>>, %arg4: memref<128x128xbf16, #tpu.memory_space<vmem>>, %arg5: memref<1x128xf32, #tpu.memory_space<vmem>>, %arg6: memref<2x64x128xf32, #tpu.memory_space<vmem>>) attributes {dimension_semantics = [#tpu.dimension_semantics<arbitrary>], iteration_bounds = array<i64: 1>, scalar_prefetch = 0 : i64, scratch_operands = 0 : i64, tpu.core_type = #tpu.core_type<tc>, window_params = [{pipeline_mode = #tpu.pipeline_mode<synchronous>, transform_indices = @transform_0, window_bounds = array<i64: 512, 128>}, {pipeline_mode = #tpu.pipeline_mode<synchronous>, transform_indices = @transform_1, window_bounds = array<i64: 128, 128>}, {pipeline_mode = #tpu.pipeline_mode<synchronous>, transform_indices = @transform_2, window_bounds = array<i64: 1, 128>}, {pipeline_mode = #tpu.pipeline_mode<synchronous>, transform_indices = @transform_3, window_bounds = array<i64: 128, 128>}, {pipeline_mode = #tpu.pipeline_mode<synchronous>, transform_indices = @transform_4, window_bounds = array<i64: 1, 128>}, {pipeline_mode = #tpu.pipeline_mode<synchronous>, transform_indices = @transform_5, window_bounds = array<i64: 2, 64, 128>}]} {
    %c0 = arith.constant 0 : index
    %c0_0 = arith.constant 0 : index
    %0 = vector.load %arg1[%c0, %c0_0] : memref<512x128xbf16, #tpu.memory_space<vmem>>, vector<512x128xbf16>
    %c0_1 = arith.constant 0 : index
    %c0_2 = arith.constant 0 : index
    %1 = vector.load %arg2[%c0_1, %c0_2] : memref<128x128xbf16, #tpu.memory_space<vmem>>, vector<128x128xbf16>
    %cst = arith.constant dense<0.000000e+00> : vector<512x128xf32>
    %2 = tpu.matmul %0, %1, %cst {dimension_numbers = #tpu.dot_dimension_numbers<[1], [0], [0], [1], [0, 0, 1, 1], [], []>} : vector<512x128xbf16>, vector<128x128xbf16>, vector<512x128xf32> -> vector<512x128xf32>
    %c0_3 = arith.constant 0 : index
    %c0_4 = arith.constant 0 : index
    %3 = vector.load %arg3[%c0_3, %c0_4] : memref<1x128xf32, #tpu.memory_space<vmem>>, vector<1x128xf32>
    %4 = vector.broadcast %3 : vector<1x128xf32> to vector<512x128xf32>
    %5 = arith.addf %2, %4 : vector<512x128xf32>
    %cst_5 = arith.constant 0.000000e+00 : f32
    %6 = vector.broadcast %cst_5 : f32 to vector<512x128xf32>
    %7 = arith.maximumf %5, %6 : vector<512x128xf32>
    %8 = vector.shape_cast %7 : vector<512x128xf32> to vector<64x8x128xf32>
    %cst_6 = arith.constant dense<0.000000e+00> : vector<64x128xf32>
    %9 = vector.multi_reduction <add>, %8, %cst_6 [1] : vector<64x8x128xf32> to vector<64x128xf32>
    %10 = arith.truncf %9 : vector<64x128xf32> to vector<64x128xbf16>
    %c0_7 = arith.constant 0 : index
    %c0_8 = arith.constant 0 : index
    %11 = vector.load %arg4[%c0_7, %c0_8] : memref<128x128xbf16, #tpu.memory_space<vmem>>, vector<128x128xbf16>
    %cst_9 = arith.constant dense<0.000000e+00> : vector<64x128xf32>
    %12 = tpu.matmul %10, %11, %cst_9 {dimension_numbers = #tpu.dot_dimension_numbers<[1], [0], [0], [1], [0, 0, 1, 1], [], []>} : vector<64x128xbf16>, vector<128x128xbf16>, vector<64x128xf32> -> vector<64x128xf32>
    %c0_10 = arith.constant 0 : index
    %c0_11 = arith.constant 0 : index
    %13 = vector.load %arg5[%c0_10, %c0_11] : memref<1x128xf32, #tpu.memory_space<vmem>>, vector<1x128xf32>
    %14 = vector.broadcast %13 : vector<1x128xf32> to vector<64x128xf32>
    %15 = arith.addf %12, %14 : vector<64x128xf32>
    %cst_12 = arith.constant dense<0xFF800000> : vector<64xf32>
    %16 = vector.multi_reduction <maximumf>, %15, %cst_12 [1] : vector<64x128xf32> to vector<64xf32>
    %17 = vector.shape_cast %16 : vector<64xf32> to vector<64x1xf32>
    %18 = vector.broadcast %17 : vector<64x1xf32> to vector<64x128xf32>
    %19 = arith.subf %15, %18 : vector<64x128xf32>
    %20 = math.exp %19 : vector<64x128xf32>
    %cst_13 = arith.constant dense<0.000000e+00> : vector<64xf32>
    %21 = vector.multi_reduction <add>, %20, %cst_13 [1] : vector<64x128xf32> to vector<64xf32>
    %22 = vector.shape_cast %21 : vector<64xf32> to vector<64x1xf32>
    %23 = tpu.reciprocal %22 {approx = true} : vector<64x1xf32> -> vector<64x1xf32>
    %24 = arith.mulf %22, %23 : vector<64x1xf32>
    %cst_14 = arith.constant 2.000000e+00 : f32
    %25 = vector.broadcast %cst_14 : f32 to vector<64x1xf32>
    %26 = arith.subf %25, %24 : vector<64x1xf32>
    %27 = arith.mulf %23, %26 : vector<64x1xf32>
    %28 = tpu.iota {dimensions = array<i32: 1>} : vector<64x128xi32>
    %29 = vector.broadcast %17 : vector<64x1xf32> to vector<64x128xf32>
    %30 = arith.cmpf oeq, %15, %29 : vector<64x128xf32>
    %c128_i32 = arith.constant 128 : i32
    %31 = vector.broadcast %c128_i32 : i32 to vector<64x128xi32>
    %32 = arith.select %30, %28, %31 : vector<64x128xi1>, vector<64x128xi32>
    %cst_15 = arith.constant dense<2147483647> : vector<64xi32>
    %33 = vector.multi_reduction <minsi>, %32, %cst_15 [1] : vector<64x128xi32> to vector<64xi32>
    %34 = vector.shape_cast %33 : vector<64xi32> to vector<64x1xi32>
    %35 = arith.sitofp %34 : vector<64x1xi32> to vector<64x1xf32>
    %36 = vector.shape_cast %35 : vector<64x1xf32> to vector<64x1xf32>
    %37 = vector.broadcast %36 : vector<64x1xf32> to vector<64x128xf32>
    %c0_16 = arith.constant 0 : index
    %c0_17 = arith.constant 0 : index
    %c0_18 = arith.constant 0 : index
    %38 = vector.load %arg6[%c0_16, %c0_17, %c0_18] : memref<2x64x128xf32, #tpu.memory_space<vmem>>, vector<1x64x128xf32>
    %39 = vector.shape_cast %38 : vector<1x64x128xf32> to vector<64x128xf32>
    %40 = vector.shape_cast %37 : vector<64x128xf32> to vector<1x64x128xf32>
    tpu.vector_store %arg6[%c0_16, %c0_17, %c0_18], %40 {strides = array<i32>} : memref<2x64x128xf32, #tpu.memory_space<vmem>>, vector<1x64x128xf32>,
    %41 = vector.shape_cast %27 : vector<64x1xf32> to vector<64x1xf32>
    %42 = vector.broadcast %41 : vector<64x1xf32> to vector<64x128xf32>
    %c1 = arith.constant 1 : index
    %c0_19 = arith.constant 0 : index
    %c0_20 = arith.constant 0 : index
    %43 = vector.load %arg6[%c1, %c0_19, %c0_20] : memref<2x64x128xf32, #tpu.memory_space<vmem>>, vector<1x64x128xf32>
    %44 = vector.shape_cast %43 : vector<1x64x128xf32> to vector<64x128xf32>
    %45 = vector.shape_cast %42 : vector<64x128xf32> to vector<1x64x128xf32>
    tpu.vector_store %arg6[%c1, %c0_19, %c0_20], %45 {strides = array<i32>} : memref<2x64x128xf32, #tpu.memory_space<vmem>>, vector<1x64x128xf32>,
    return
  }
  func.func @transform_0(%arg0: i32) -> (i32, i32) {
    %c0_i32 = arith.constant 0 : i32
    %c0_i32_0 = arith.constant 0 : i32
    %c0_i32_1 = arith.constant 0 : i32
    return %c0_i32, %c0_i32_0 : i32, i32
  }
  func.func @transform_1(%arg0: i32) -> (i32, i32) {
    %c0_i32 = arith.constant 0 : i32
    %c0_i32_0 = arith.constant 0 : i32
    %c0_i32_1 = arith.constant 0 : i32
    return %c0_i32, %c0_i32_0 : i32, i32
  }
  func.func @transform_2(%arg0: i32) -> (i32, i32) {
    %c0_i32 = arith.constant 0 : i32
    %c0_i32_0 = arith.constant 0 : i32
    %c0_i32_1 = arith.constant 0 : i32
    return %c0_i32, %c0_i32_0 : i32, i32
  }
  func.func @transform_3(%arg0: i32) -> (i32, i32) {
    %c0_i32 = arith.constant 0 : i32
    %c0_i32_0 = arith.constant 0 : i32
    %c0_i32_1 = arith.constant 0 : i32
    return %c0_i32, %c0_i32_0 : i32, i32
  }
  func.func @transform_4(%arg0: i32) -> (i32, i32) {
    %c0_i32 = arith.constant 0 : i32
    %c0_i32_0 = arith.constant 0 : i32
    %c0_i32_1 = arith.constant 0 : i32
    return %c0_i32, %c0_i32_0 : i32, i32
  }
  func.func @transform_5(%arg0: i32) -> (i32, i32, i32) {
    %c0_i32 = arith.constant 0 : i32
    %c0_i32_0 = arith.constant 0 : i32
    %c0_i32_1 = arith.constant 0 : i32
    %c0_i32_2 = arith.constant 0 : i32
    return %c0_i32, %c0_i32_0, %c0_i32_1 : i32, i32, i32
  }
}

</mosaic_0001>

<bundles_post_ra>
// kernel: squeeze.3
= control target key start
LH: loop header
LB: loop body
LE: loop exit
PB: predicated region body
PF: predicated region fallthrough
CT: control target
= control target key end

     0   :  { %vm7_vm0 = vcmask 261120   ;;  %s39_s0 = inlined_call_operand.vmem [shape: f32[64], index: 0, kind: input, shape index: {}]   ;;  %s40_s1 = inlined_call_operand.vmem [shape: f32[2,32], index: 1, kind: output, shape index: {}]  }
   0x1   :  { %v4_v0 = vld [vmem:[%s39_s0] sm:$0x1]  ;;  %s22_s0 = smov 96  }
   0x2   :  { %5 = vst [vmem:[#allocation1] sm:$0x1] %v4_v0 }
   0x9   :  { %v9_v1 = vld [vmem:[#allocation1] sm:$0x1]  }
   0xa   :  { %v6_v2 = vld [vmem:[#allocation1] sm:$0x1]   ;;  %10 = vrot.lane.b32.xlu0 %v9_v1, %s22_s0 }
   0xb   :  { %8 = vst.msk [vmem:[#allocation0] sm:$0x1] %vm7_vm0, %v6_v2  }
  0x7c   :  { %v11_v3 = vpop.permute.xlu0 %10  }
  0x7d   :  { %14 = vst.msk [vmem:[#allocation0 + $0x1] sm:$0x1] %vm7_vm0, %v11_v3  }
  0x84   :  { %v17_v4 = vld [vmem:[#allocation0] sm:$0x3] }
  0x85   :  { %20 = vst [vmem:[%s40_s1] sm:$0x3] %v17_v4 }

// kernel: recognition_forward.1
= control target key start
LH: loop header
LB: loop body
LE: loop exit
PB: predicated region body
PF: predicated region fallthrough
CT: control target
= control target key end

     0   :  { %vm1173_vm0 = vcmask 1041409   ;;  %vm1175_vm1 = vcmask 1042434   ;;  %vm1177_vm2 = vcmask 1043459   ;;  %vm1179_vm3 = vcmask 1044484   ;;  %s2594_s1 = inlined_call_operand.vmem [shape: bf16[128,128], index: 1, kind: input, shape index: {}]   ;;  %s2595_s2 = inlined_call_operand.vmem [shape: f32[1,128], index: 2, kind: input, shape index: {}]   ;;  %s2596_s0 = inlined_call_operand.vmem [shape: bf16[512,128], index: 0, kind: input, shape index: {}]   ;;  %s2597_s3 = inlined_call_operand.vmem [shape: bf16[128,128], index: 3, kind: input, shape index: {}]   ;;  %s2598_s4 = inlined_call_operand.vmem [shape: f32[1,128], index: 4, kind: input, shape index: {}]   ;;  %s2599_s5 = inlined_call_operand.vmem [shape: f32[2,64,128], index: 5, kind: output, shape index: {}]  }
   0x1   :  { %v1807_v0 = vld [vmem:[%s2594_s1 + $0x38] sm:$0xff]  ;;  %v1806_v1 = vld [vmem:[%s2594_s1 + $0x30] sm:$0xff]  ;;  %v1805_v2 = vld [vmem:[%s2594_s1 + $0x28] sm:$0xff]  ;;  %vm1181_vm4 = vcmask 1045509   ;;  %vm1183_vm5 = vcmask 1046534   ;;  %vm1185_vm6 = vcmask 1047559  }
   0x2   :  { %344 = vmatpush.bf16.msra.mxu0 %v1807_v0  ;;  %1816 = vmatpush.bf16.msra.mxu1 %v1807_v0  ;;  %v1804_v3 = vld [vmem:[%s2594_s1 + $0x20] sm:$0xff]  ;;  %v1803_v4 = vld [vmem:[%s2594_s1 + $0x18] sm:$0xff]  ;;  %v1802_v5 = vld [vmem:[%s2594_s1 + $0x10] sm:$0xff] }
   0x3   :  { %1817 = vmatpush.bf16.msra.mxu2 %v1807_v0  ;;  %1818 = vmatpush.bf16.msra.mxu3 %v1807_v0  ;;  %v1801_v6 = vld [vmem:[%s2594_s1 + $0x8] sm:$0xff]  ;;  %v1800_v7 = vld [vmem:[%s2594_s1] sm:$0xff]  ;;  %v1782_v10 = vld [vmem:[%s2596_s0 + $0x70] sm:$0xff] }
   0x4   :  { %v1768_v8 = vld [vmem:[%s2596_s0] sm:$0xff]  ;;  %v1777_v9 = vld [vmem:[%s2596_s0 + $0x48] sm:$0xff]  ;;  %v1791_v11 = vld [vmem:[%s2596_s0 + $0xb8] sm:$0xff] }
   0x5   :  { %v1769_v12 = vld [vmem:[%s2596_s0 + $0x8] sm:$0xff]  ;;  %v1778_v13 = vld [vmem:[%s2596_s0 + $0x50] sm:$0xff]  ;;  %v1783_v14 = vld [vmem:[%s2596_s0 + $0x78] sm:$0xff] }
   0x6   :  { %345 = vmatpush.bf16.msra.mxu0 %v1806_v1  ;;  %1819 = vmatpush.bf16.msra.mxu1 %v1806_v1  ;;  %v1792_v15 = vld [vmem:[%s2596_s0 + $0xc0] sm:$0xff]  ;;  %v1770_v16 = vld [vmem:[%s2596_s0 + $0x10] sm:$0xff]  ;;  %v1779_v17 = vld [vmem:[%s2596_s0 + $0x58] sm:$0xff] }
   0x7   :  { %1820 = vmatpush.bf16.msra.mxu2 %v1806_v1  ;;  %1821 = vmatpush.bf16.msra.mxu3 %v1806_v1  ;;  %v1784_v18 = vld [vmem:[%s2596_s0 + $0x80] sm:$0xff]  ;;  %v1793_v19 = vld [vmem:[%s2596_s0 + $0xc8] sm:$0xff]  ;;  %v1771_v20 = vld [vmem:[%s2596_s0 + $0x18] sm:$0xff] }
   0x8   :  { %v1780_v21 = vld [vmem:[%s2596_s0 + $0x60] sm:$0xff]  ;;  %v1785_v22 = vld [vmem:[%s2596_s0 + $0x88] sm:$0xff]  ;;  %v1794_v23 = vld [vmem:[%s2596_s0 + $0xd0] sm:$0xff] }
   0x9   :  { %v1772_v24 = vld [vmem:[%s2596_s0 + $0x20] sm:$0xff]  ;;  %v1781_v25 = vld [vmem:[%s2596_s0 + $0x68] sm:$0xff]  ;;  %v1786_v26 = vld [vmem:[%s2596_s0 + $0x90] sm:$0xff] }
   0xa   :  { %346 = vmatpush.bf16.msra.mxu0 %v1805_v2  ;;  %1822 = vmatpush.bf16.msra.mxu1 %v1805_v2  ;;  %v1795_v27 = vld [vmem:[%s2596_s0 + $0xd8] sm:$0xff]  ;;  %v1773_v28 = vld [vmem:[%s2596_s0 + $0x28] sm:$0xff]  ;;  %v1796_v30 = vld [vmem:[%s2596_s0 + $0xe0] sm:$0xff] }
   0xb   :  { %1823 = vmatpush.bf16.msra.mxu2 %v1805_v2  ;;  %1824 = vmatpush.bf16.msra.mxu3 %v1805_v2  ;;  %v1787_v29 = vld [vmem:[%s2596_s0 + $0x98] sm:$0xff]  ;;  %v1774_v31 = vld [vmem:[%s2596_s0 + $0x30] sm:$0xff]  ;;  %v1788_v32 = vld [vmem:[%s2596_s0 + $0xa0] sm:$0xff] }
   0xc   :  { %v1797_v33 = vld [vmem:[%s2596_s0 + $0xe8] sm:$0xff]  ;;  %v1775_v34 = vld [vmem:[%s2596_s0 + $0x38] sm:$0xff]  ;;  %v1798_v36 = vld [vmem:[%s2596_s0 + $0xf0] sm:$0xff] }
   0xd   :  { %v1789_v35 = vld [vmem:[%s2596_s0 + $0xa8] sm:$0xff]  ;;  %v2019_v37 = vld [vmem:[%s2595_s2] ss:$0 sm:$0xff]  ;;  %v1790_v40 = vld [vmem:[%s2596_s0 + $0xb0] sm:$0xff] }
   0xe   :  { %347 = vmatpush.bf16.msra.mxu0 %v1804_v3  ;;  %1825 = vmatpush.bf16.msra.mxu1 %v1804_v3  ;;  %v1776_v38 = vld [vmem:[%s2596_s0 + $0x40] sm:$0xff]  ;;  %v1799_v41 = vld [vmem:[%s2596_s0 + $0xf8] sm:$0xff] }
   0xf   :  { %1826 = vmatpush.bf16.msra.mxu2 %v1804_v3  ;;  %1827 = vmatpush.bf16.msra.mxu3 %v1804_v3 }
  0x12   :  { %348 = vmatpush.bf16.msra.mxu0 %v1803_v4  ;;  %1828 = vmatpush.bf16.msra.mxu1 %v1803_v4 }
  0x13   :  { %1829 = vmatpush.bf16.msra.mxu2 %v1803_v4  ;;  %1830 = vmatpush.bf16.msra.mxu3 %v1803_v4 }
  0x16   :  { %349 = vmatpush.bf16.msra.mxu0 %v1802_v5  ;;  %1831 = vmatpush.bf16.msra.mxu1 %v1802_v5 }
  0x17   :  { %1832 = vmatpush.bf16.msra.mxu2 %v1802_v5  ;;  %1833 = vmatpush.bf16.msra.mxu3 %v1802_v5 }
  0x1a   :  { %350 = vmatpush.bf16.msra.mxu0 %v1801_v6  ;;  %1834 = vmatpush.bf16.msra.mxu1 %v1801_v6 }
  0x1b   :  { %1835 = vmatpush.bf16.msra.mxu2 %v1801_v6  ;;  %1836 = vmatpush.bf16.msra.mxu3 %v1801_v6 }
  0x1e   :  { %351 = vmatpush.bf16.msra.mxu0 %v1800_v7  ;;  %1837 = vmatpush.bf16.msra.mxu1 %v1800_v7 }
  0x1f   :  { %1838 = vmatpush.bf16.msra.mxu2 %v1800_v7  ;;  %1839 = vmatpush.bf16.msra.mxu3 %v1800_v7 }
  0x21   :  { %352 = vmatmul.bf16.vlgmr.msra.gmra.mxu0 %v1768_v8  ;;  %397 = vmatmul.bf16.vlgmr.msra.gmra.mxu1 %v1777_v9 }
  0x22   :  { %422 = vmatmul.bf16.vlgmr.msra.gmra.mxu2 %v1782_v10  ;;  %467 = vmatmul.bf16.vlgmr.msra.gmra.mxu3 %v1791_v11 }
  0x31   :  { %357 = vmatmul.bf16.gmra.mxu0 %v1769_v12  ;;  %402 = vmatmul.bf16.gmra.mxu1 %v1778_v13 }
  0x32   :  { %427 = vmatmul.bf16.gmra.mxu2 %v1783_v14  ;;  %472 = vmatmul.bf16.gmra.mxu3 %v1792_v15 }
  0x41   :  { %362 = vmatmul.bf16.gmra.mxu0 %v1770_v16  ;;  %407 = vmatmul.bf16.gmra.mxu1 %v1779_v17 }
  0x42   :  { %432 = vmatmul.bf16.gmra.mxu2 %v1784_v18  ;;  %477 = vmatmul.bf16.gmra.mxu3 %v1793_v19 }
  0x51   :  { %367 = vmatmul.bf16.gmra.mxu0 %v1771_v20  ;;  %412 = vmatmul.bf16.gmra.mxu1 %v1780_v21 }
  0x52   :  { %437 = vmatmul.bf16.gmra.mxu2 %v1785_v22  ;;  %482 = vmatmul.bf16.gmra.mxu3 %v1794_v23 }
  0x61   :  { %372 = vmatmul.bf16.gmra.mxu0 %v1772_v24  ;;  %417 = vmatmul.bf16.gmra.mxu1 %v1781_v25 }
  0x62   :  { %442 = vmatmul.bf16.gmra.mxu2 %v1786_v26  ;;  %487 = vmatmul.bf16.gmra.mxu3 %v1795_v27 }
  0x71   :  { %377 = vmatmul.bf16.gmra.mxu0 %v1773_v28 }
  0x72   :  { %447 = vmatmul.bf16.gmra.mxu2 %v1787_v29  ;;  %492 = vmatmul.bf16.gmra.mxu3 %v1796_v30 }
  0x81   :  { %382 = vmatmul.bf16.gmra.mxu0 %v1774_v31 }
  0x82   :  { %452 = vmatmul.bf16.gmra.mxu2 %v1788_v32  ;;  %497 = vmatmul.bf16.gmra.mxu3 %v1797_v33 }
  0x91   :  { %387 = vmatmul.bf16.gmra.mxu0 %v1775_v34 }
  0x92   :  { %457 = vmatmul.bf16.gmra.mxu2 %v1789_v35  ;;  %502 = vmatmul.bf16.gmra.mxu3 %v1798_v36 }
  0x9e   :  { %v353_v39 = vpop.f32.mrf.mxu0  ;;  %v398_v44 = vpop.f32.mrf.mxu1 }
  0x9f   :  { %v354_v42 = vadd.f32 %v2019_v37, %v353_v39  ;;  %v399_v52 = vadd.f32 %v2019_v37, %v398_v44 }
  0xa1   :  { %v513_v43 = vmax.f32 %v354_v42, 0.0  ;;  %392 = vmatmul.bf16.gmra.mxu0 %v1776_v38  ;;  %v531_v56 = vmax.f32 %v399_v52, 0.0 }
  0xa2   :  { %462 = vmatmul.bf16.gmra.mxu2 %v1790_v40  ;;  %507 = vmatmul.bf16.gmra.mxu3 %v1799_v41 }
  0xa3   :  { %v577_v45 = vrot.slane %v513_v43, 4  ;;  %v685_v0 = vrot.slane %v531_v56, 4 }
  0xa5   :  { %v578_v46 = vadd.f32 %v577_v45, %v513_v43  ;;  %v423_v47 = vpop.f32.mrf.mxu2  ;;  %v468_v48 = vpop.f32.mrf.mxu3  ;;  %v686_v6 = vadd.f32 %v685_v0, %v531_v56 }
  0xa6   :  { %v355_v49 = vpop.f32.mrf.mxu0  ;;  %v400_v57 = vpop.f32.mrf.mxu1  ;;  %v424_v3 = vadd.f32 %v2019_v37, %v423_v47  ;;  %v469_v7 = vadd.f32 %v2019_v37, %v468_v48 }
  0xa7   :  { %v579_v50 = vrot.slane %v578_v46, 2  ;;  %v356_v51 = vadd.f32 %v2019_v37, %v355_v49  ;;  %v401_v13 = vadd.f32 %v2019_v37, %v400_v57  ;;  %v687_v19 = vrot.slane %v686_v6, 2 }
  0xa8   :  { %v541_v15 = vmax.f32 %v424_v3, 0.0  ;;  %v559_v20 = vmax.f32 %v469_v7, 0.0 }
  0xa9   :  { %v580_v53 = vadd.f32 %v579_v50, %v578_v46  ;;  %v514_v54 = vmax.f32 %v356_v51, 0.0  ;;  %v532_v24 = vmax.f32 %v401_v13, 0.0  ;;  %v688_v30 = vadd.f32 %v687_v19, %v686_v6 }
  0xaa   :  { %v745_v26 = vrot.slane %v541_v15, 4  ;;  %v853_v31 = vrot.slane %v559_v20, 4 }
  0xab   :  { %v583_v55 = vrot.slane %v514_v54, 4  ;;  %v581_v58 = vrot.slane %v580_v53, 1  ;;  %v691_v36 = vrot.slane %v532_v24, 4  ;;  %v689_v44 = vrot.slane %v688_v30, 1 }
  0xac   :  { %v746_v40 = vadd.f32 %v745_v26, %v541_v15  ;;  %v854_v45 = vadd.f32 %v853_v31, %v559_v20 }
  0xad   :  { %v584_v59 = vadd.f32 %v583_v55, %v514_v54  ;;  %v425_v60 = vpop.f32.mrf.mxu2  ;;  %v2033_v61 = vpop.f32.mrf.mxu3  ;;  %v582_v1 = vadd.f32 %v581_v58, %v580_v53  ;;  %v692_v50 = vadd.f32 %v691_v36, %v532_v24  ;;  %v690_v57 = vadd.f32 %v689_v44, %v688_v30 }
  0xae   :  { %v358_v62 = vpop.f32.mrf.mxu0  ;;  %v403_v18 = vpop.f32.mrf.mxu1  ;;  %v747_v53 = vrot.slane %v746_v40, 2  ;;  %v426_v54 = vadd.f32 %v2019_v37, %v425_v60  ;;  %v855_v58 = vrot.slane %v854_v45, 2 }
  0xaf   :  { %v585_v63 = vrot.slane %v584_v59, 2  ;;  %v359_v5 = vadd.f32 %v2019_v37, %v358_v62  ;;  %v961_v8 = vpack.c.bf16 %v582_v1, %v582_v1  ;;  %v693_v3 = vrot.slane %v692_v50, 2 }
  0xb0   :  { %v748_v7 = vadd.f32 %v747_v53, %v746_v40  ;;  %v404_v15 = vadd.f32 %v2019_v37, %v403_v18 }
  0xb1   :  { %v586_v2 = vadd.f32 %v585_v63, %v584_v59  ;;  %v515_v10 = vmax.f32 %v359_v5, 0.0  ;;  %v1109_v21 = vunpack.c.l.b16 %v961_v8  ;;  %v471_v63 = vadd.f32 %v2019_v37, %v2033_v61 }
  0xb2   :  { %v542_v8 = vmax.f32 %v426_v54, 0.0  ;;  %v694_v19 = vadd.f32 %v693_v3, %v692_v50  ;;  %v533_v30 = vmax.f32 %v404_v15, 0.0 }
  0xb3   :  { %v587_v4 = vrot.slane %v586_v2, 1  ;;  %v589_v17 = vrot.slane %v515_v10, 4 }
  0xb5   :  { %v588_v9 = vadd.f32 %v587_v4, %v586_v2  ;;  %v2038_v11 = vpop.f32.mrf.mxu2  ;;  %v473_v12 = vpop.f32.mrf.mxu3  ;;  %v590_v23 = vadd.f32 %v589_v17, %v515_v10  ;;  %v979_v10 = vpack.c.bf16 %v690_v57, %v690_v57 }
  0xb6   :  { %v360_v14 = vpop.f32.mrf.mxu0  ;;  %v474_v25 = vadd.f32 %v2019_v37, %v473_v12  ;;  %v2048_v49 = vpop.f32.mrf.mxu1  ;;  %v856_v12 = vadd.f32 %v855_v58, %v854_v45 }
  0xb7   :  { %v962_v16 = vpack.c.bf16 %v588_v9, %v588_v9  ;;  %v591_v28 = vrot.slane %v590_v23, 2  ;;  %v361_v29 = vadd.f32 %v2019_v37, %v360_v14  ;;  %v560_v14 = vmax.f32 %v471_v63, 0.0 }
  0xb8   :  { %v561_v32 = vmax.f32 %v474_v25, 0.0  ;;  %v2060_v26 = vunpack.c.l.b16 %v979_v10 }
  0xb9   :  { %v1110_v22 = vunpack.c.l.b16 %v962_v16  ;;  %v592_v33 = vadd.f32 %v591_v28, %v590_v23  ;;  %v516_v34 = vmax.f32 %v361_v29, 0.0  ;;  %v429_v23 = vadd.f32 %v2019_v37, %v2038_v11 }
  0xba   :  { %v865_v38 = vrot.slane %v561_v32, 4  ;;  %v859_v29 = vrot.slane %v560_v14, 4 }
  0xbb   :  { %v1174_v27 = vsel %vm1173_vm0, %v1110_v22, %v1109_v21  ;;  %v593_v41 = vrot.slane %v592_v33, 1  ;;  %v595_v42 = vrot.slane %v516_v34, 4  ;;  %v749_v21 = vrot.slane %v748_v7, 1 }
  0xbc   :  { %v866_v46 = vadd.f32 %v865_v38, %v561_v32  ;;  %v751_v22 = vrot.slane %v542_v8, 4 }
  0xbd   :  { %v2044_v35 = vpop.f32.mrf.mxu2  ;;  %v475_v43 = vpop.f32.mrf.mxu3  ;;  %v594_v47 = vadd.f32 %v593_v41, %v592_v33  ;;  %v596_v48 = vadd.f32 %v595_v42, %v516_v34  ;;  %v695_v33 = vrot.slane %v694_v19, 1  ;;  %v750_v11 = vadd.f32 %v749_v21, %v748_v7 }
  0xbe   :  { %v2046_v39 = vpop.f32.mrf.mxu0  ;;  %v867_v51 = vrot.slane %v866_v46, 2  ;;  %v476_v52 = vadd.f32 %v2019_v37, %v475_v43  ;;  %v408_v25 = vpop.f32.mrf.mxu1  ;;  %v752_v41 = vadd.f32 %v751_v22, %v542_v8  ;;  %v543_v42 = vmax.f32 %v429_v23, 0.0 }
  0xbf   :  { %v963_v55 = vpack.c.bf16 %v594_v47, %v594_v47  ;;  %v597_v56 = vrot.slane %v596_v48, 2  ;;  %v696_v57 = vadd.f32 %v695_v33, %v694_v19 }
  0xc0   :  { %v868_v59 = vadd.f32 %v867_v51, %v866_v46  ;;  %v562_v62 = vmax.f32 %v476_v52, 0.0  ;;  %v406_v51 = vadd.f32 %v2019_v37, %v2048_v49  ;;  %v364_v52 = vadd.f32 %v2019_v37, %v2046_v39 }
  0xc1   :  { %v1111_v0 = vunpack.c.l.b16 %v963_v55  ;;  %v598_v1 = vadd.f32 %v597_v56, %v596_v48  ;;  %v697_v48 = vrot.slane %v533_v30, 4  ;;  %v753_v58 = vrot.slane %v752_v41, 2 }
  0xc2   :  { %v869_v4 = vrot.slane %v868_v59, 1  ;;  %v871_v5 = vrot.slane %v562_v62, 4  ;;  %v534_v49 = vmax.f32 %v406_v51, 0.0  ;;  %v431_v39 = vadd.f32 %v2019_v37, %v2044_v35 }
  0xc3   :  { %v1176_v60 = vsel %vm1175_vm1, %v1111_v0, %v1174_v27  ;;  %v599_v9 = vrot.slane %v598_v1, 1  ;;  %v857_v27 = vrot.slane %v856_v12, 1 }
  0xc4   :  { %v872_v13 = vadd.f32 %v871_v5, %v562_v62  ;;  %v870_v61 = vadd.f32 %v869_v4, %v868_v59  ;;  %v860_v59 = vadd.f32 %v859_v29, %v560_v14  ;;  %v757_v62 = vrot.slane %v543_v42, 4 }
  0xc5   :  { %v433_v2 = vpop.f32.mrf.mxu2  ;;  %v600_v16 = vadd.f32 %v599_v9, %v598_v1  ;;  %v478_v17 = vpop.f32.mrf.mxu3  ;;  %v858_v44 = vadd.f32 %v857_v27, %v856_v12  ;;  %v698_v4 = vadd.f32 %v697_v48, %v533_v30  ;;  %v517_v5 = vmax.f32 %v364_v52, 0.0 }
  0xc6   :  { %v2054_v6 = vpop.f32.mrf.mxu0  ;;  %v873_v20 = vrot.slane %v872_v13, 2  ;;  %v1009_v18 = vpack.c.bf16 %v870_v61, %v870_v61  ;;  %v434_v36 = vadd.f32 %v2019_v37, %v433_v2  ;;  %v479_v38 = vadd.f32 %v2019_v37, %v478_v17  ;;  %v2078_v7 = vpop.f32.mrf.mxu1 }
  0xc7   :  { %v964_v24 = vpack.c.bf16 %v600_v16, %v600_v16  ;;  %v989_v14 = vpack.c.bf16 %v750_v11, %v750_v11  ;;  %v1007_v15 = vpack.c.bf16 %v858_v44, %v858_v44  ;;  %v754_v61 = vadd.f32 %v753_v58, %v752_v41 }
  0xc8   :  { %v874_v28 = vadd.f32 %v873_v20, %v872_v13  ;;  %v545_v46 = vmax.f32 %v434_v36, 0.0  ;;  %v563_v47 = vmax.f32 %v479_v38, 0.0  ;;  %v1157_v50 = vunpack.c.l.b16 %v1009_v18 }
  0xc9   :  { %v1112_v31 = vunpack.c.l.b16 %v964_v24  ;;  %v758_v16 = vadd.f32 %v757_v62, %v543_v42  ;;  %v409_v17 = vadd.f32 %v2019_v37, %v408_v25  ;;  %v861_v21 = vrot.slane %v860_v59, 2 }
  0xca   :  { %v875_v34 = vrot.slane %v874_v28, 1  ;;  %v769_v54 = vrot.slane %v545_v46, 4  ;;  %v877_v55 = vrot.slane %v563_v47, 4  ;;  %v699_v22 = vrot.slane %v698_v4, 2 }
  0xcb   :  { %v2067_v43 = vsel %vm1177_vm2, %v1112_v31, %v1176_v60  ;;  %v703_v23 = vrot.slane %v534_v49, 4  ;;  %v544_v24 = vmax.f32 %v431_v39, 0.0  ;;  %v601_v27 = vrot.slane %v517_v5, 4 }
  0xcc   :  { %v876_v45 = vadd.f32 %v875_v34, %v874_v28  ;;  %v770_v1 = vadd.f32 %v769_v54, %v545_v46  ;;  %v878_v2 = vadd.f32 %v877_v55, %v563_v47  ;;  %v2084_v18 = vunpack.c.l.b16 %v989_v14 }
  0xcd   :  { %v435_v32 = vpop.f32.mrf.mxu2  ;;  %v2074_v63 = vpop.f32.mrf.mxu3  ;;  %v980_v31 = vpack.c.bf16 %v696_v57, %v696_v57  ;;  %v759_v33 = vrot.slane %v758_v16, 2  ;;  %v535_v34 = vmax.f32 %v409_v17, 0.0  ;;  %v2086_v11 = vunpack.c.l.b16 %v1007_v15 }
  0xce   :  { %v2064_v40 = vpop.f32.mrf.mxu0  ;;  %v1010_v53 = vpack.c.bf16 %v876_v45, %v876_v45  ;;  %v436_v56 = vadd.f32 %v2019_v37, %v435_v32  ;;  %v771_v9 = vrot.slane %v770_v1, 2  ;;  %v879_v10 = vrot.slane %v878_v2, 2  ;;  %v413_v57 = vpop.f32.mrf.mxu1 }
  0xcf   :  { %v755_v32 = vrot.slane %v754_v61, 1  ;;  %2604 = vst [vmem:[#allocation2_spill] sm:$0xff] %v2086_v11  ;;  %v700_v41 = vadd.f32 %v699_v22, %v698_v4  ;;  %v704_v42 = vadd.f32 %v703_v23, %v534_v49  ;;  %v763_v44 = vrot.slane %v544_v24, 4 }
  0xd0   :  { %v1158_v0 = vunpack.c.l.b16 %v1010_v53  ;;  %v546_v3 = vmax.f32 %v436_v56, 0.0  ;;  %v772_v19 = vadd.f32 %v771_v9, %v770_v1  ;;  %v880_v20 = vadd.f32 %v879_v10, %v878_v2 }
  0xd1   :  { %v602_v47 = vadd.f32 %v601_v27, %v517_v5  ;;  %v2094_v53 = vunpack.c.l.b16 %v980_v31  ;;  %v862_v54 = vadd.f32 %v861_v21, %v860_v59  ;;  %v760_v55 = vadd.f32 %v759_v33, %v758_v16 }
  0xd2   :  { %v1222_v60 = vsel %vm1173_vm0, %v1158_v0, %v1157_v50  ;;  %v775_v12 = vrot.slane %v546_v3, 4  ;;  %v773_v28 = vrot.slane %v772_v19, 1  ;;  %v881_v29 = vrot.slane %v880_v20, 1 }
  0xd3   :  { %v366_v56 = vadd.f32 %v2019_v37, %v2054_v6  ;;  %v756_v58 = vadd.f32 %v755_v32, %v754_v61  ;;  %v709_v62 = vrot.slane %v535_v34, 4  ;;  %v701_v2 = vrot.slane %v700_v41, 1 }
  0xd4   :  { %v776_v35 = vadd.f32 %v775_v12, %v546_v3  ;;  %v774_v36 = vadd.f32 %v773_v28, %v772_v19  ;;  %v882_v38 = vadd.f32 %v881_v29, %v880_v20  ;;  %v705_v3 = vrot.slane %v704_v42, 2 }
  0xd5   :  { %v438_v8 = vpop.f32.mrf.mxu2  ;;  %v2088_v45 = vpop.f32.mrf.mxu3  ;;  %v764_v4 = vadd.f32 %v763_v44, %v544_v24  ;;  %v603_v39 = vrot.slane %v602_v47, 2  ;;  %v761_v10 = vrot.slane %v760_v55, 1  ;;  %v518_v12 = vmax.f32 %v366_v56, 0.0  ;;  %v1815_v44 = vld [vmem:[%s2597_s3 + $0x38] sm:$0xff] }
  0xd6   :  { %v2081_v13 = vpop.f32.mrf.mxu0  ;;  %v777_v30 = vrot.slane %v776_v35, 2  ;;  %v993_v48 = vpack.c.bf16 %v774_v36, %v774_v36  ;;  %v1011_v50 = vpack.c.bf16 %v882_v38, %v882_v38  ;;  %v439_v49 = vadd.f32 %v2019_v37, %v438_v8  ;;  %1292 = vmatpush.bf16.msrb.mxu1 %v1815_v44 }
  0xd7   :  { %v481_v6 = vadd.f32 %v2019_v37, %v2074_v63  ;;  %v710_v15 = vadd.f32 %v709_v62, %v535_v34  ;;  %v411_v61 = vadd.f32 %v2019_v37, %v2078_v7  ;;  %v369_v8 = vadd.f32 %v2019_v37, %v2064_v40 }
  0xd8   :  { %v778_v25 = vadd.f32 %v777_v30, %v776_v35  ;;  %v1159_v0 = vunpack.c.l.b16 %v1011_v50  ;;  %v1141_v5 = vunpack.c.l.b16 %v993_v48  ;;  %v547_v14 = vmax.f32 %v439_v49, 0.0 }
  0xd9   :  { %v863_v17 = vrot.slane %v862_v54, 1  ;;  %v765_v19 = vrot.slane %v764_v4, 2  ;;  %v990_v21 = vpack.c.bf16 %v756_v58, %v756_v58  ;;  %v706_v22 = vadd.f32 %v705_v3, %v704_v42  ;;  %v415_v42 = vpop.f32.mrf.mxu1 }
  0xda   :  { %v779_v51 = vrot.slane %v778_v25, 1  ;;  %v2100_v9 = vsel %vm1175_vm1, %v1159_v0, %v1222_v60  ;;  %v414_v60 = vadd.f32 %v2019_v37, %v413_v57  ;;  %v781_v20 = vrot.slane %v547_v14, 4 }
  0xdb   :  { %2605 = vst [vmem:[#allocation3_spill] sm:$0xff] %v2100_v9  ;;  %v604_v23 = vadd.f32 %v603_v39, %v602_v47  ;;  %v702_v7 = vadd.f32 %v701_v2, %v700_v41  ;;  %v607_v27 = vrot.slane %v518_v12, 4  ;;  %v564_v28 = vmax.f32 %v481_v6, 0.0 }
  0xdc   :  { %v780_v1 = vadd.f32 %v779_v51, %v778_v25  ;;  %v782_v29 = vadd.f32 %v781_v20, %v547_v14  ;;  %v762_v30 = vadd.f32 %v761_v10, %v760_v55  ;;  %v711_v31 = vrot.slane %v710_v15, 2 }
  0xdd   :  { %v2090_v46 = vpop.f32.mrf.mxu2  ;;  %v2116_v40 = vpop.f32.mrf.mxu3  ;;  %v536_v32 = vmax.f32 %v411_v61, 0.0  ;;  %v519_v33 = vmax.f32 %v369_v8, 0.0  ;;  %v2118_v34 = vadd.f32 %v863_v17, %v862_v54  ;;  %v766_v36 = vadd.f32 %v765_v19, %v764_v4 }
  0xde   :  { %v2092_v52 = vpop.f32.mrf.mxu0  ;;  %v994_v59 = vpack.c.bf16 %v780_v1, %v780_v1  ;;  %v537_v38 = vmax.f32 %v414_v60, 0.0  ;;  %v783_v25 = vrot.slane %v782_v29, 2  ;;  %v2123_v41 = vunpack.c.l.b16 %v990_v21 }
  0xdf   :  { %v707_v47 = vrot.slane %v706_v22, 1  ;;  %v605_v48 = vrot.slane %v604_v23, 1  ;;  %v416_v50 = vadd.f32 %v2019_v37, %v415_v42  ;;  %v981_v51 = vpack.c.bf16 %v702_v7, %v702_v7 }
  0xe0   :  { %v1142_v16 = vunpack.c.l.b16 %v994_v59  ;;  %v608_v55 = vadd.f32 %v607_v27, %v518_v12  ;;  %v883_v56 = vrot.slane %v564_v28, 4  ;;  %v784_v57 = vadd.f32 %v783_v25, %v782_v29 }
  0xe1   :  { %v991_v54 = vpack.c.bf16 %v762_v30, %v762_v30  ;;  %v712_v58 = vadd.f32 %v711_v31, %v710_v15  ;;  %v715_v62 = vrot.slane %v536_v32, 4  ;;  %v613_v0 = vrot.slane %v519_v33, 4  ;;  %v418_v25 = vpop.f32.mrf.mxu1 }
  0xe2   :  { %v2112_v63 = vsel %vm1173_vm0, %v1142_v16, %v1141_v5  ;;  %v767_v1 = vrot.slane %v766_v36, 1  ;;  %v721_v2 = vrot.slane %v537_v38, 4  ;;  %v785_v3 = vrot.slane %v784_v57, 1 }
  0xe3   :  { %v484_v4 = vadd.f32 %v2019_v37, %v2088_v45  ;;  %v708_v39 = vadd.f32 %v707_v47, %v706_v22  ;;  %v606_v5 = vadd.f32 %v605_v48, %v604_v23  ;;  %v371_v59 = vadd.f32 %v2019_v37, %v2081_v13 }
  0xe4   :  { %v538_v10 = vmax.f32 %v416_v50, 0.0  ;;  %v2132_v12 = vunpack.c.l.b16 %v981_v51  ;;  %v609_v6 = vrot.slane %v608_v55, 2  ;;  %v884_v14 = vadd.f32 %v883_v56, %v564_v28 }
  0xe5   :  { %v2109_v35 = vpop.f32.mrf.mxu2  ;;  %v786_v15 = vadd.f32 %v785_v3, %v784_v57  ;;  %v2136_v16 = vunpack.c.l.b16 %v991_v54  ;;  %v713_v8 = vrot.slane %v712_v58, 1  ;;  %v716_v17 = vadd.f32 %v715_v62, %v536_v32  ;;  %v488_v22 = vpop.f32.mrf.mxu3 }
  0xe6   :  { %v2114_v24 = vpop.f32.mrf.mxu0  ;;  %v614_v45 = vadd.f32 %v613_v0, %v519_v33  ;;  %v2138_v19 = vadd.f32 %v767_v1, %v766_v36  ;;  %v722_v60 = vadd.f32 %v721_v2, %v537_v38  ;;  %v565_v21 = vmax.f32 %v484_v4, 0.0 }
  0xe7   :  { %v995_v20 = vpack.c.bf16 %v786_v15, %v786_v15  ;;  %v982_v13 = vpack.c.bf16 %v708_v39, %v708_v39  ;;  %v965_v23 = vpack.c.bf16 %v606_v5, %v606_v5  ;;  %v520_v7 = vmax.f32 %v371_v59, 0.0 }
  0xe8   :  { %v727_v27 = vrot.slane %v538_v10, 4  ;;  %v610_v29 = vadd.f32 %v609_v6, %v608_v55  ;;  %v885_v28 = vrot.slane %v884_v14, 2  ;;  %v441_v31 = vadd.f32 %v2019_v37, %v2090_v46 }
  0xe9   :  { %v1143_v30 = vunpack.c.l.b16 %v995_v20  ;;  %v714_v42 = vadd.f32 %v713_v8, %v712_v58  ;;  %v717_v32 = vrot.slane %v716_v17, 2  ;;  %v615_v33 = vrot.slane %v614_v45, 2 }
  0xea   :  { %v419_v36 = vadd.f32 %v2019_v37, %v418_v25  ;;  %v723_v38 = vrot.slane %v722_v60, 2  ;;  %v889_v47 = vrot.slane %v565_v21, 4  ;;  %v486_v48 = vadd.f32 %v2019_v37, %v2116_v40 }
  0xeb   :  { %v2145_v44 = vsel %vm1175_vm1, %v1143_v30, %v2112_v63  ;;  %v2151_v51 = vunpack.c.l.b16 %v982_v13  ;;  %v2153_v46 = vunpack.c.l.b16 %v965_v23  ;;  %v619_v55 = vrot.slane %v520_v7, 4  ;;  %v1814_v63 = vld [vmem:[%s2597_s3 + $0x30] sm:$0xff]  ;;  %v420_v30 = vpop.f32.mrf.mxu1 }
  0xec   :  { %v728_v56 = vadd.f32 %v727_v27, %v538_v10  ;;  %v611_v57 = vrot.slane %v610_v29, 1  ;;  %v886_v54 = vadd.f32 %v885_v28, %v884_v14  ;;  %v548_v58 = vmax.f32 %v441_v31, 0.0  ;;  %1293 = vmatpush.bf16.msrb.mxu1 %v1814_v63 }
  0xed   :  { %v2128_v49 = vpop.f32.mrf.mxu2  ;;  %2606 = vst [vmem:[#allocation4_spill] sm:$0xff] %v2151_v51  ;;  %v374_v62 = vadd.f32 %v2019_v37, %v2092_v52  ;;  %v983_v0 = vpack.c.bf16 %v714_v42, %v714_v42  ;;  %v718_v40 = vadd.f32 %v717_v32, %v716_v17  ;;  %v616_v1 = vadd.f32 %v615_v33, %v614_v45 }
  0xee   :  { %v2134_v61 = vpop.f32.mrf.mxu0  ;;  %v539_v2 = vmax.f32 %v419_v36, 0.0  ;;  %v724_v3 = vadd.f32 %v723_v38, %v722_v60  ;;  %v890_v4 = vadd.f32 %v889_v47, %v565_v21  ;;  %v566_v39 = vmax.f32 %v486_v48, 0.0  ;;  %v2167_v60 = vpop.f32.mrf.mxu3  ;;  %v1813_v38 = vld [vmem:[%s2597_s3 + $0x28] sm:$0xff] }
  0xef   :  { %v444_v5 = vadd.f32 %v2019_v37, %v2109_v35  ;;  %v620_v10 = vadd.f32 %v619_v55, %v520_v7  ;;  %v729_v6 = vrot.slane %v728_v56, 2  ;;  %v489_v52 = vadd.f32 %v2019_v37, %v488_v22 }
  0xf0   :  { %v376_v14 = vadd.f32 %v2019_v37, %v2114_v24  ;;  %v612_v15 = vadd.f32 %v611_v57, %v610_v29  ;;  %v887_v8 = vrot.slane %v886_v54, 1  ;;  %v787_v17 = vrot.slane %v548_v58, 4  ;;  %1294 = vmatpush.bf16.msrb.mxu1 %v1813_v38 }
  0xf1   :  { %v521_v45 = vmax.f32 %v374_v62, 0.0  ;;  %v2169_v20 = vunpack.c.l.b16 %v983_v0  ;;  %v719_v21 = vrot.slane %v718_v40, 1  ;;  %v617_v35 = vrot.slane %v616_v1, 1 }
  0xf2   :  { %v733_v13 = vrot.slane %v539_v2, 4  ;;  %v725_v23 = vrot.slane %v724_v3, 1  ;;  %v891_v27 = vrot.slane %v890_v4, 2  ;;  %v895_v7 = vrot.slane %v566_v39, 4 }
  0xf3   :  { %2607 = vst [vmem:[#allocation5_spill] sm:$0xff] %v2169_v20  ;;  %v549_v28 = vmax.f32 %v444_v5, 0.0  ;;  %v621_v31 = vrot.slane %v620_v10, 2  ;;  %v730_v24 = vadd.f32 %v729_v6, %v728_v56  ;;  %v567_v29 = vmax.f32 %v489_v52, 0.0  ;;  %v1812_v52 = vld [vmem:[%s2597_s3 + $0x20] sm:$0xff] }
  0xf4   :  { %v522_v25 = vmax.f32 %v376_v14, 0.0  ;;  %v966_v42 = vpack.c.bf16 %v612_v15, %v612_v15  ;;  %v888_v32 = vadd.f32 %v887_v8, %v886_v54  ;;  %v788_v33 = vadd.f32 %v787_v17, %v548_v58  ;;  %1295 = vmatpush.bf16.msrb.mxu1 %v1812_v52 }
  0xf5   :  { %v2149_v50 = vpop.f32.mrf.mxu2  ;;  %v625_v36 = vrot.slane %v521_v45, 4  ;;  %v2176_v47 = vadd.f32 %v719_v21, %v718_v40  ;;  %v618_v48 = vadd.f32 %v617_v35, %v616_v1  ;;  %v734_v55 = vadd.f32 %v733_v13, %v539_v2 }
  0xf6   :  { %v2162_v59 = vpop.f32.mrf.mxu0  ;;  %v421_v57 = vadd.f32 %v2019_v37, %v420_v30  ;;  %v726_v62 = vadd.f32 %v725_v23, %v724_v3  ;;  %v892_v63 = vadd.f32 %v891_v27, %v890_v4  ;;  %v896_v0 = vadd.f32 %v895_v7, %v566_v39  ;;  %v2188_v13 = vpop.f32.mrf.mxu3 }
  0xf7   :  { %v793_v56 = vrot.slane %v549_v28, 4  ;;  %v622_v5 = vadd.f32 %v621_v31, %v620_v10  ;;  %v731_v6 = vrot.slane %v730_v24, 1  ;;  %v901_v54 = vrot.slane %v567_v29, 4 }
  0xf8   :  { %v631_v58 = vrot.slane %v522_v25, 4  ;;  %v2182_v14 = vunpack.c.l.b16 %v966_v42  ;;  %v1012_v40 = vpack.c.bf16 %v888_v32, %v888_v32  ;;  %v789_v1 = vrot.slane %v788_v33, 2 }
  0xf9   :  { %v626_v2 = vadd.f32 %v625_v36, %v521_v45  ;;  %v967_v3 = vpack.c.bf16 %v618_v48, %v618_v48  ;;  %v735_v4 = vrot.slane %v734_v55, 2  ;;  %v540_v39 = vmax.f32 %v421_v57, 0.0 }
  0xfa   :  { %v446_v10 = vadd.f32 %v2019_v37, %v2128_v49  ;;  %v985_v8 = vpack.c.bf16 %v726_v62, %v726_v62  ;;  %v893_v17 = vrot.slane %v892_v63, 1  ;;  %v897_v21 = vrot.slane %v896_v0, 2 }
  0xfb   :  { %v794_v35 = vadd.f32 %v793_v56, %v549_v28  ;;  %v623_v27 = vrot.slane %v622_v5, 1  ;;  %v732_v7 = vadd.f32 %v731_v6, %v730_v24  ;;  %v902_v45 = vadd.f32 %v901_v54, %v567_v29 }
  0xfc   :  { %v632_v30 = vadd.f32 %v631_v58, %v522_v25  ;;  %v2192_v31 = vunpack.c.l.b16 %v1012_v40  ;;  %v790_v42 = vadd.f32 %v789_v1, %v788_v33  ;;  %v627_v32 = vrot.slane %v626_v2, 2 }
  0xfd   :  { %v2171_v22 = vpop.f32.mrf.mxu2  ;;  %v379_v49 = vadd.f32 %v2019_v37, %v2134_v61  ;;  %v2196_v36 = vunpack.c.l.b16 %v967_v3  ;;  %v736_v38 = vadd.f32 %v735_v4, %v734_v55  ;;  %v739_v28 = vrot.slane %v540_v39, 4 }
  0xfe   :  { %v2184_v15 = vpop.f32.mrf.mxu0  ;;  %2608 = vst [vmem:[#allocation6_spill] sm:$0xff] %v2192_v31  ;;  %v550_v48 = vmax.f32 %v446_v10, 0.0  ;;  %v1133_v57 = vunpack.c.l.b16 %v985_v8  ;;  %v894_v62 = vadd.f32 %v893_v17, %v892_v63  ;;  %v898_v56 = vadd.f32 %v897_v21, %v896_v0 }
  0xff   :  { %v795_v52 = vrot.slane %v794_v35, 2  ;;  %v624_v9 = vadd.f32 %v623_v27, %v622_v5  ;;  %v986_v24 = vpack.c.bf16 %v732_v7, %v732_v7  ;;  %v903_v29 = vrot.slane %v902_v45, 2 }
 0x100   :  { %v633_v25 = vrot.slane %v632_v30, 2  ;;  %v791_v6 = vrot.slane %v790_v42, 1  ;;  %v628_v54 = vadd.f32 %v627_v32, %v626_v2  ;;  %v523_v33 = vmax.f32 %v379_v49, 0.0  ;;  %v2208_v32 = vpop.f32.mrf.mxu3 }
 0x101   :  { %v449_v58 = vadd.f32 %v2019_v37, %v2149_v50  ;;  %v737_v61 = vrot.slane %v736_v38, 1  ;;  %v740_v40 = vadd.f32 %v739_v28, %v540_v39  ;;  %v799_v1 = vrot.slane %v550_v48, 4 }
 0x102   :  { %v381_v55 = vadd.f32 %v2019_v37, %v2162_v59  ;;  %v1013_v3 = vpack.c.bf16 %v894_v62, %v894_v62  ;;  %v899_v63 = vrot.slane %v898_v56, 1  ;;  %v796_v0 = vadd.f32 %v795_v52, %v794_v35 }
 0x103   :  { %v491_v5 = vadd.f32 %v2019_v37, %v2167_v60  ;;  %v968_v2 = vpack.c.bf16 %v624_v9, %v624_v9  ;;  %v1134_v8 = vunpack.c.l.b16 %v986_v24  ;;  %v904_v17 = vadd.f32 %v903_v29, %v902_v45  ;;  %v1811_v9 = vld [vmem:[%s2597_s3 + $0x18] sm:$0xff] }
 0x104   :  { %v634_v50 = vadd.f32 %v633_v25, %v632_v30  ;;  %v792_v21 = vadd.f32 %v791_v6, %v790_v42  ;;  %v629_v39 = vrot.slane %v628_v54, 1  ;;  %v637_v27 = vrot.slane %v523_v33, 4  ;;  %1296 = vmatpush.bf16.msrb.mxu1 %v1811_v9 }
 0x105   :  { %v2190_v23 = vpop.f32.mrf.mxu2  ;;  %v551_v7 = vmax.f32 %v449_v58, 0.0  ;;  %v738_v59 = vadd.f32 %v737_v61, %v736_v38  ;;  %v741_v49 = vrot.slane %v740_v40, 2  ;;  %v800_v35 = vadd.f32 %v799_v1, %v550_v48 }
 0x106   :  { %v2204_v4 = vpop.f32.mrf.mxu0  ;;  %v524_v28 = vmax.f32 %v381_v55, 0.0  ;;  %v2210_v62 = vunpack.c.l.b16 %v1013_v3  ;;  %v900_v60 = vadd.f32 %v899_v63, %v898_v56  ;;  %v797_v52 = vrot.slane %v796_v0, 1 }
 0x107   :  { %v568_v31 = vmax.f32 %v491_v5, 0.0  ;;  %v2215_v45 = vunpack.c.l.b16 %v968_v2  ;;  %v1201_v30 = vsel %vm1173_vm0, %v1134_v8, %v1133_v57  ;;  %v905_v42 = vrot.slane %v904_v17, 1  ;;  %v1810_v57 = vld [vmem:[%s2597_s3 + $0x10] sm:$0xff] }
 0x108   :  { %2609 = vst [vmem:[#allocation7_spill] sm:$0xff] %v2210_v62  ;;  %v635_v24 = vrot.slane %v634_v50, 1  ;;  %v996_v29 = vpack.c.bf16 %v792_v21, %v792_v21  ;;  %v630_v38 = vadd.f32 %v629_v39, %v628_v54  ;;  %v638_v25 = vadd.f32 %v637_v27, %v523_v33  ;;  %1297 = vmatpush.bf16.msrb.mxu1 %v1810_v57  ;;  %v2231_v9 = vpop.f32.mrf.mxu3 }
 0x109   :  { %v805_v48 = vrot.slane %v551_v7, 4  ;;  %v987_v6 = vpack.c.bf16 %v738_v59, %v738_v59  ;;  %v742_v58 = vadd.f32 %v741_v49, %v740_v40  ;;  %v801_v56 = vrot.slane %v800_v35, 2 }
 0x10a   :  { %v643_v61 = vrot.slane %v524_v28, 4  ;;  %v1014_v1 = vpack.c.bf16 %v900_v60, %v900_v60  ;;  %v798_v55 = vadd.f32 %v797_v52, %v796_v0  ;;  %v907_v3 = vrot.slane %v568_v31, 4 }
 0x10b   :  { %v451_v63 = vadd.f32 %v2019_v37, %v2171_v22  ;;  %v906_v5 = vadd.f32 %v905_v42, %v904_v17  ;;  %v636_v2 = vadd.f32 %v635_v24, %v634_v50  ;;  %v384_v54 = vadd.f32 %v2019_v37, %v2184_v15 }
 0x10c   :  { %v454_v33 = vadd.f32 %v2019_v37, %v2190_v23  ;;  %v2227_v40 = vunpack.c.l.b16 %v996_v29  ;;  %v969_v8 = vpack.c.bf16 %v630_v38, %v630_v38  ;;  %v639_v0 = vrot.slane %v638_v25, 2  ;;  %v1809_v23 = vld [vmem:[%s2597_s3 + $0x8] sm:$0xff] }
 0x10d   :  { %v2206_v10 = vpop.f32.mrf.mxu2  ;;  %v806_v21 = vadd.f32 %v805_v48, %v551_v7  ;;  %v1135_v22 = vunpack.c.l.b16 %v987_v6  ;;  %v743_v59 = vrot.slane %v742_v58, 1  ;;  %v802_v49 = vadd.f32 %v801_v56, %v800_v35  ;;  %1298 = vmatpush.bf16.msrb.mxu1 %v1809_v23 }
 0x10e   :  { %v388_v39 = vpop.f32.mrf.mxu0  ;;  %v644_v60 = vadd.f32 %v643_v61, %v524_v28  ;;  %v2229_v17 = vunpack.c.l.b16 %v1014_v1  ;;  %v997_v50 = vpack.c.bf16 %v798_v55, %v798_v55  ;;  %v908_v52 = vadd.f32 %v907_v3, %v568_v31 }
 0x10f   :  { %v552_v15 = vmax.f32 %v451_v63, 0.0  ;;  %v1015_v42 = vpack.c.bf16 %v906_v5, %v906_v5  ;;  %v970_v7 = vpack.c.bf16 %v636_v2, %v636_v2  ;;  %v525_v24 = vmax.f32 %v384_v54, 0.0 }
 0x110   :  { %2610 = vst [vmem:[#allocation8_spill] sm:$0xff] %v2229_v17  ;;  %v553_v29 = vmax.f32 %v454_v33, 0.0  ;;  %v1117_v38 = vunpack.c.l.b16 %v969_v8  ;;  %v640_v48 = vadd.f32 %v639_v0, %v638_v25  ;;  %v807_v6 = vrot.slane %v806_v21, 2  ;;  %v1808_v25 = vld [vmem:[%s2597_s3] sm:$0xff] }
 0x111   :  { %v386_v35 = vadd.f32 %v2019_v37, %v2204_v4  ;;  %v2239_v31 = vsel %vm1175_vm1, %v1135_v22, %v1201_v30  ;;  %v744_v28 = vadd.f32 %v743_v59, %v742_v58  ;;  %v803_v56 = vrot.slane %v802_v49, 1  ;;  %1299 = vmatpush.bf16.msrb.mxu1 %v1808_v25 }
 0x112   :  { %v645_v61 = vrot.slane %v644_v60, 2  ;;  %v2241_v1 = vunpack.c.l.b16 %v997_v50  ;;  %v909_v55 = vrot.slane %v908_v52, 2  ;;  %v811_v3 = vrot.slane %v552_v15, 4 }
 0x113   :  { %v456_v63 = vadd.f32 %v2019_v37, %v2206_v10  ;;  %v2248_v57 = vunpack.c.l.b16 %v1015_v42  ;;  %v1118_v4 = vunpack.c.l.b16 %v970_v7  ;;  %v649_v5 = vrot.slane %v525_v24, 4  ;;  %v2257_v42 = vld [vmem:[%s2595_s2] ss:$0 sm:$0xff] }
 0x114   :  { %v817_v30 = vrot.slane %v553_v29, 4  ;;  %v641_v2 = vrot.slane %v640_v48, 1  ;;  %v808_v58 = vadd.f32 %v807_v6, %v806_v21  ;;  %v526_v54 = vmax.f32 %v386_v35, 0.0 }
 0x115   :  { %v458_v27 = vpop.f32.mrf.mxu2  ;;  %2611 = vst [vmem:[#allocation9_spill] sm:$0xff] %v2248_v57  ;;  %v554_v33 = vmax.f32 %v456_v63, 0.0  ;;  %v988_v8 = vpack.c.bf16 %v744_v28, %v744_v28  ;;  %v804_v0 = vadd.f32 %v803_v56, %v802_v49  ;;  %v494_v22 = vadd.f32 %v2019_v37, %v2188_v13 }
 0x116   :  { %v646_v10 = vadd.f32 %v645_v61, %v644_v60  ;;  %v812_v59 = vadd.f32 %v811_v3, %v552_v15  ;;  %v496_v50 = vadd.f32 %v2019_v37, %v2208_v32  ;;  %v389_v21 = vadd.f32 %v2257_v42, %v388_v39  ;;  %v390_v7 = vpop.f32.mrf.mxu0  ;;  %v500_v37 = vpop.f32.mrf.mxu3 }
 0x117   :  { %v823_v23 = vrot.slane %v554_v33, 4  ;;  %v1187_v49 = vsel %vm1173_vm0, %v1118_v4, %v1117_v38  ;;  %v910_v35 = vadd.f32 %v909_v55, %v908_v52  ;;  %v650_v28 = vadd.f32 %v649_v5, %v525_v24 }
 0x118   :  { %v818_v13 = vadd.f32 %v817_v30, %v553_v29  ;;  %v642_v60 = vadd.f32 %v641_v2, %v640_v48  ;;  %v809_v15 = vrot.slane %v808_v58, 1  ;;  %v655_v56 = vrot.slane %v526_v54, 4 }
 0x119   :  { %v824_v61 = vadd.f32 %v823_v23, %v554_v33  ;;  %v647_v32 = vrot.slane %v646_v10, 1  ;;  %v527_v3 = vmax.f32 %v389_v21, 0.0  ;;  %v459_v63 = vadd.f32 %v2257_v42, %v458_v27 }
 0x11a   :  { %v391_v25 = vadd.f32 %v2257_v42, %v390_v7  ;;  %v2263_v57 = vunpack.c.l.b16 %v988_v8  ;;  %v569_v39 = vmax.f32 %v494_v22, 0.0  ;;  %v813_v17 = vrot.slane %v812_v59, 2 }
 0x11b   :  { %v570_v62 = vmax.f32 %v496_v50, 0.0  ;;  %v651_v38 = vrot.slane %v650_v28, 2  ;;  %v819_v52 = vrot.slane %v818_v13, 2  ;;  %v555_v24 = vmax.f32 %v459_v63, 0.0 }
 0x11c   :  { %v528_v29 = vmax.f32 %v391_v25, 0.0  ;;  %v998_v48 = vpack.c.bf16 %v804_v0, %v804_v0  ;;  %v971_v55 = vpack.c.bf16 %v642_v60, %v642_v60  ;;  %v656_v4 = vadd.f32 %v655_v56, %v526_v54 }
 0x11d   :  { %v460_v6 = vpop.f32.mrf.mxu2  ;;  %v825_v5 = vrot.slane %v824_v61, 2  ;;  %v810_v30 = vadd.f32 %v809_v15, %v808_v58  ;;  %v648_v2 = vadd.f32 %v647_v32, %v646_v10  ;;  %v661_v33 = vrot.slane %v527_v3, 4 }
 0x11e   :  { %v829_v23 = vrot.slane %v555_v24, 4  ;;  %v911_v27 = vrot.slane %v910_v35, 1  ;;  %v913_v21 = vrot.slane %v569_v39, 4  ;;  %v814_v7 = vadd.f32 %v813_v17, %v812_v59  ;;  %v393_v60 = vpop.f32.mrf.mxu0 }
 0x11f   :  { %v667_v8 = vrot.slane %v528_v29, 4  ;;  %v919_v11 = vrot.slane %v570_v62, 4  ;;  %v652_v22 = vadd.f32 %v651_v38, %v650_v28  ;;  %v820_v20 = vadd.f32 %v819_v52, %v818_v13  ;;  %v503_v13 = vpop.f32.mrf.mxu3 }
 0x120   :  { %v830_v50 = vadd.f32 %v829_v23, %v555_v24  ;;  %v2265_v51 = vunpack.c.l.b16 %v998_v48  ;;  %v1119_v63 = vunpack.c.l.b16 %v971_v55  ;;  %v657_v25 = vrot.slane %v656_v4, 2 }
 0x121   :  { %v826_v0 = vadd.f32 %v825_v5, %v824_v61  ;;  %v999_v56 = vpack.c.bf16 %v810_v30, %v810_v30  ;;  %v972_v58 = vpack.c.bf16 %v648_v2, %v648_v2  ;;  %v2269_v10 = vadd.f32 %v2257_v42, %v2231_v9 }
 0x122   :  { %v662_v15 = vadd.f32 %v661_v33, %v527_v3  ;;  %v2271_v17 = vadd.f32 %v911_v27, %v910_v35  ;;  %v815_v59 = vrot.slane %v814_v7, 1  ;;  %v831_v28 = vrot.slane %v830_v50, 2 }
 0x123   :  { %2612 = vst [vmem:[#allocation10_spill] sm:$0xff] %v2269_v10  ;;  %v668_v32 = vadd.f32 %v667_v8, %v528_v29  ;;  %v2273_v38 = vadd.f32 %v913_v21, %v569_v39  ;;  %v2275_v52 = vadd.f32 %v919_v11, %v570_v62  ;;  %v653_v61 = vrot.slane %v652_v22, 1 }
 0x124   :  { %v821_v24 = vrot.slane %v820_v20, 1  ;;  %v1188_v48 = vsel %vm1175_vm1, %v1119_v63, %v1187_v49  ;;  %v658_v55 = vadd.f32 %v657_v25, %v656_v4  ;;  %v827_v5 = vrot.slane %v826_v0, 1 }
 0x125   :  { %v463_v54 = vpop.f32.mrf.mxu2  ;;  %2613 = vst [vmem:[#allocation11_spill] sm:$0xff] %v2273_v38  ;;  %v461_v9 = vadd.f32 %v2257_v42, %v460_v6  ;;  %v2279_v30 = vunpack.c.l.b16 %v999_v56  ;;  %v1120_v35 = vunpack.c.l.b16 %v972_v58  ;;  %v2600_v3 = vmax.f32 %v2269_v10, 0.0 }
 0x126   :  { %2614 = vst [vmem:[#allocation12_spill] sm:$0xff] %v2275_v52  ;;  %v663_v2 = vrot.slane %v662_v15, 2  ;;  %v2282_v33 = vadd.f32 %v815_v59, %v814_v7  ;;  %v832_v39 = vadd.f32 %v831_v28, %v830_v50  ;;  %v669_v29 = vrot.slane %v668_v32, 2  ;;  %v395_v58 = vpop.f32.mrf.mxu0 }
 0x127   :  { %v556_v11 = vmax.f32 %v461_v9, 0.0  ;;  %v654_v62 = vadd.f32 %v653_v61, %v652_v22  ;;  %v822_v23 = vadd.f32 %v821_v24, %v820_v20  ;;  %v2285_v27 = vadd.f32 %v2257_v42, %v500_v37 }
 0x128   :  { %v394_v49 = vadd.f32 %v2257_v42, %v393_v60  ;;  %v659_v4 = vrot.slane %v658_v55, 1  ;;  %v828_v6 = vadd.f32 %v827_v5, %v826_v0  ;;  %v464_v8 = vadd.f32 %v2257_v42, %v463_v54  ;;  %v505_v5 = vpop.f32.mrf.mxu3 }
 0x129   :  { %v835_v21 = vrot.slane %v556_v11, 4  ;;  %v2290_v63 = vsel %vm1177_vm2, %v1120_v35, %v1188_v48  ;;  %v2294_v7 = vrot.slane %v2600_v3, 4  ;;  %v664_v50 = vadd.f32 %v663_v2, %v662_v15 }
 0x12a   :  { %v529_v22 = vmax.f32 %v394_v49, 0.0  ;;  %v833_v20 = vrot.slane %v832_v39, 1  ;;  %v670_v25 = vadd.f32 %v669_v29, %v668_v32  ;;  %v557_v56 = vmax.f32 %v464_v8, 0.0 }
 0x12b   :  { %2615 = vst [vmem:[#allocation13_spill] sm:$0xff] %v2294_v7  ;;  %v836_v37 = vadd.f32 %v835_v21, %v556_v11  ;;  %v973_v59 = vpack.c.bf16 %v654_v62, %v654_v62  ;;  %v1001_v0 = vpack.c.bf16 %v822_v23, %v822_v23  ;;  %v660_v61 = vadd.f32 %v659_v4, %v658_v55 }
 0x12c   :  { %v673_v54 = vrot.slane %v529_v22, 4  ;;  %v1002_v24 = vpack.c.bf16 %v828_v6, %v828_v6  ;;  %v841_v9 = vrot.slane %v557_v56, 4  ;;  %v665_v35 = vrot.slane %v664_v50, 1 }
 0x12d   :  { %v465_v60 = vpop.f32.mrf.mxu2  ;;  %v837_v48 = vrot.slane %v836_v37, 2  ;;  %v396_v15 = vadd.f32 %v2257_v42, %v395_v58  ;;  %v834_v2 = vadd.f32 %v833_v20, %v832_v39  ;;  %v671_v29 = vrot.slane %v670_v25, 1 }
 0x12e   :  { %v674_v3 = vadd.f32 %v673_v54, %v529_v22  ;;  %v466_v32 = vadd.f32 %v2257_v42, %v465_v60  ;;  %v842_v49 = vadd.f32 %v841_v9, %v557_v56  ;;  %v1149_v62 = vunpack.c.l.b16 %v1001_v0 }
 0x12f   :  { %v838_v11 = vadd.f32 %v837_v48, %v836_v37  ;;  %v530_v21 = vmax.f32 %v396_v15, 0.0  ;;  %v974_v28 = vpack.c.bf16 %v660_v61, %v660_v61  ;;  %v2300_v55 = vadd.f32 %v2257_v42, %v503_v13 }
 0x130   :  { %v675_v23 = vrot.slane %v674_v3, 2  ;;  %v558_v8 = vmax.f32 %v466_v32, 0.0  ;;  %v843_v6 = vrot.slane %v842_v49, 2  ;;  %v666_v52 = vadd.f32 %v665_v35, %v664_v50 }
 0x131   :  { %v839_v4 = vrot.slane %v838_v11, 1  ;;  %v679_v54 = vrot.slane %v530_v21, 4  ;;  %v1150_v38 = vunpack.c.l.b16 %v1002_v24  ;;  %v1003_v60 = vpack.c.bf16 %v834_v2, %v834_v2  ;;  %v508_v2 = vpop.f32.mrf.mxu3 }
 0x132   :  { %v676_v22 = vadd.f32 %v675_v23, %v674_v3  ;;  %v847_v58 = vrot.slane %v558_v8, 4  ;;  %v672_v39 = vadd.f32 %v671_v29, %v670_v25  ;;  %v844_v20 = vadd.f32 %v843_v6, %v842_v49 }
 0x133   :  { %v840_v37 = vadd.f32 %v839_v4, %v838_v11  ;;  %v680_v0 = vadd.f32 %v679_v54, %v530_v21  ;;  %v1121_v9 = vunpack.c.l.b16 %v973_v59  ;;  %v1122_v15 = vunpack.c.l.b16 %v974_v28 }
 0x134   :  { %v677_v56 = vrot.slane %v676_v22, 1  ;;  %v848_v48 = vadd.f32 %v847_v58, %v558_v8  ;;  %v573_v61 = vmax.f32 %v2300_v55, 0.0  ;;  %v845_v13 = vrot.slane %v844_v20, 1 }
 0x135   :  { %v975_v32 = vpack.c.bf16 %v666_v52, %v666_v52  ;;  %v681_v10 = vrot.slane %v680_v0, 2  ;;  %v1151_v3 = vunpack.c.l.b16 %v1003_v60  ;;  %v976_v35 = vpack.c.bf16 %v672_v39, %v672_v39 }
 0x136   :  { %v678_v7 = vadd.f32 %v677_v56, %v676_v22  ;;  %v849_v50 = vrot.slane %v848_v48, 2  ;;  %v2304_v24 = vadd.f32 %v2257_v42, %v505_v5  ;;  %v846_v25 = vadd.f32 %v845_v13, %v844_v20 }
 0x137   :  { %v1215_v29 = vsel %vm1173_vm0, %v1150_v38, %v1149_v62  ;;  %v1004_v11 = vpack.c.bf16 %v840_v37, %v840_v37  ;;  %v682_v49 = vadd.f32 %v681_v10, %v680_v0  ;;  %v1123_v52 = vunpack.c.l.b16 %v975_v32 }
 0x138   :  { %v850_v59 = vadd.f32 %v849_v50, %v848_v48  ;;  %v977_v28 = vpack.c.bf16 %v678_v7, %v678_v7  ;;  %v1005_v23 = vpack.c.bf16 %v846_v25, %v846_v25  ;;  %v2308_v21 = vadd.f32 %v2257_v42, %v508_v2 }
 0x139   :  { %v683_v8 = vrot.slane %v682_v49, 1  ;;  %v1216_v5 = vsel %vm1175_vm1, %v1151_v3, %v1215_v29  ;;  %v1124_v6 = vunpack.c.l.b16 %v976_v35  ;;  %v1180_v38 = vsel %vm1179_vm3, %v2153_v46, %v2067_v43  ;;  %v510_v35 = vpop.f32.mrf.mxu3 }
 0x13a   :  { %v851_v4 = vrot.slane %v850_v59, 1  ;;  %v1152_v10 = vunpack.c.l.b16 %v1004_v11  ;;  %v1182_v22 = vsel %vm1181_vm4, %v2182_v14, %v1180_v38  ;;  %v1125_v54 = vunpack.c.l.b16 %v977_v28 }
 0x13b   :  { %v684_v62 = vadd.f32 %v683_v8, %v682_v49  ;;  %v1153_v58 = vunpack.c.l.b16 %v1005_v23  ;;  %v1184_v60 = vsel %vm1183_vm5, %v2196_v36, %v1182_v22  ;;  %v1190_v43 = vsel %vm1179_vm3, %v1121_v9, %v2290_v63  ;;  %v2618_v23 = vld [vmem:[#allocation2_spill] sm:$0xff] }
 0x13c   :  { %v852_v7 = vadd.f32 %v851_v4, %v850_v59  ;;  %v1186_v37 = vsel %vm1185_vm6, %v2215_v45, %v1184_v60  ;;  %v1191_v46 = vsel %vm1181_vm4, %v1122_v15, %v1190_v43  ;;  %v984_v56 = vpack.c.bf16 %v2176_v47, %v2176_v47 }
 0x13d   :  { %v978_v39 = vpack.c.bf16 %v684_v62, %v684_v62  ;;  %v992_v14 = vpack.c.bf16 %v2138_v19, %v2138_v19  ;;  %v1203_v36 = vsel %vm1177_vm2, %v2263_v57, %v2239_v31  ;;  %v1192_v13 = vsel %vm1183_vm5, %v1123_v52, %v1191_v46  ;;  %v2621_v62 = vld [vmem:[#allocation7_spill] sm:$0xff] }
 0x13e   :  { %v1006_v20 = vpack.c.bf16 %v852_v7, %v852_v7  ;;  %v1204_v45 = vsel %vm1179_vm3, %v2084_v18, %v1203_v36  ;;  %v1193_v63 = vsel %vm1185_vm6, %v1124_v6, %v1192_v13  ;;  %v1132_v9 = vunpack.c.l.b16 %v984_v56  ;;  %v2620_v6 = vld [vmem:[#allocation6_spill] sm:$0xff]  ;;  %v2627_v56 = vld [vmem:[#allocation13_spill] sm:$0xff]  ;;  %v2629_v13 = vld [vmem:[#allocation12_spill] sm:$0xff] }
 0x13f   :  { %v1126_v0 = vunpack.c.l.b16 %v978_v39  ;;  %v1140_v15 = vunpack.c.l.b16 %v992_v14  ;;  %v1205_v47 = vsel %vm1181_vm4, %v2123_v41, %v1204_v45  ;;  %v1236_v32 = vpack.c.b16 %v1193_v63, %v1186_v37  ;;  %v2624_v37 = vld [vmem:[#allocation9_spill] sm:$0xff] }
 0x140   :  { %v1154_v48 = vunpack.c.l.b16 %v1006_v20  ;;  %v1206_v31 = vsel %vm1183_vm5, %v2136_v16, %v1205_v47  ;;  %v1000_v57 = vpack.c.bf16 %v2282_v33, %v2282_v33  ;;  %v1008_v3 = vpack.c.bf16 %v2118_v34, %v2118_v34 }
 0x141   :  { %v1194_v19 = vsel %vm1173_vm0, %v1126_v0, %v1125_v54  ;;  %v1207_v18 = vsel %vm1185_vm6, %v1140_v15, %v1206_v31  ;;  %v1210_v41 = vsel %vm1177_vm2, %v2227_v40, %v2145_v44  ;;  %1300 = vmatmul.bf16.vlgmr.msrb.gmra.mxu1 %v1236_v32  ;;  %v2616_v40 = vld [vmem:[#allocation4_spill] sm:$0xff]  ;;  %v511_v59 = vadd.f32 %v2257_v42, %v510_v35 }
 0x142   :  { %v1195_v50 = vsel %vm1175_vm1, %v2060_v26, %v1194_v19  ;;  %v1148_v25 = vunpack.c.l.b16 %v1000_v57  ;;  %v1211_v33 = vsel %vm1179_vm3, %v2241_v1, %v1210_v41  ;;  %v1217_v26 = vsel %vm1177_vm2, %v1152_v10, %v1216_v5  ;;  %v2619_v5 = vld [vmem:[#allocation3_spill] sm:$0xff]  ;;  %v2622_v54 = vld [vmem:[#allocation8_spill] sm:$0xff] }
 0x143   :  { %v1196_v16 = vsel %vm1177_vm2, %v2094_v53, %v1195_v50  ;;  %v1156_v29 = vunpack.c.l.b16 %v1008_v3  ;;  %v1212_v34 = vsel %vm1181_vm4, %v2265_v51, %v1211_v33  ;;  %v1218_v44 = vsel %vm1179_vm3, %v1153_v58, %v1217_v26 }
 0x144   :  { %v1197_v2 = vsel %vm1179_vm3, %v2132_v12, %v1196_v16  ;;  %v1213_v53 = vsel %vm1183_vm5, %v2279_v30, %v1212_v34  ;;  %v1219_v49 = vsel %vm1181_vm4, %v1154_v48, %v1218_v44  ;;  %v1016_v1 = vpack.c.bf16 %v2271_v17, %v2271_v17  ;;  %v2617_v12 = vld [vmem:[#allocation5_spill] sm:$0xff] }
 0x145   :  { %v1198_v11 = vsel %vm1181_vm4, %v2616_v40, %v1197_v2  ;;  %v2370_v51 = vsel %vm1185_vm6, %v1148_v25, %v1213_v53  ;;  %v1220_v52 = vsel %vm1183_vm5, %v2618_v23, %v1219_v49  ;;  %v1224_v17 = vsel %vm1177_vm2, %v2620_v6, %v2619_v5 }
 0x146   :  { %v1199_v28 = vsel %vm1183_vm5, %v2617_v12, %v1198_v11  ;;  %v2376_v30 = vsel %vm1185_vm6, %v1156_v29, %v1220_v52  ;;  %v1164_v4 = vunpack.c.l.b16 %v1016_v1  ;;  %v574_v42 = vmax.f32 %v2304_v24, 0.0  ;;  %v2625_v24 = vld [vmem:[#allocation10_spill] sm:$0xff] }
 0x147   :  { %v1200_v8 = vsel %vm1185_vm6, %v1132_v9, %v1199_v28  ;;  %v1238_v10 = vpack.c.b16 %v2376_v30, %v2370_v51  ;;  %v1225_v7 = vsel %vm1179_vm3, %v2621_v62, %v1224_v17  ;;  %v575_v22 = vmax.f32 %v2308_v21, 0.0  ;;  %v2628_v21 = vld [vmem:[#allocation11_spill] sm:$0xff] }
 0x148   :  { %v1237_v38 = vpack.c.b16 %v1207_v18, %v1200_v8  ;;  %v1226_v58 = vsel %vm1181_vm4, %v2622_v54, %v1225_v7  ;;  %v2623_v60 = vmax.f32 %v2285_v27, 0.0  ;;  %v576_v20 = vmax.f32 %v511_v59, 0.0 }
 0x149   :  { %v1227_v43 = vsel %vm1183_vm5, %v2624_v37, %v1226_v58  ;;  %v2626_v46 = vmax.f32 %v2625_v24, 0.0  ;;  %v937_v36 = vrot.slane %v573_v61, 4  ;;  %v915_v48 = vrot.slane %v2628_v21, 2 }
 0x14a   :  { %v931_v39 = vrot.slane %v2623_v60, 4  ;;  %v2399_v0 = vsel %vm1185_vm6, %v1164_v4, %v1227_v43  ;;  %v921_v45 = vrot.slane %v2629_v13, 2  ;;  %v943_v63 = vrot.slane %v574_v42, 4 }
 0x14b   :  { %v926_v14 = vadd.f32 %v2627_v56, %v2626_v46  ;;  %v949_v9 = vrot.slane %v575_v22, 4  ;;  %v2630_v15 = vmov %v2623_v60  ;;  %v955_v19 = vrot.slane %v576_v20, 4 }
 0x14c   :  { %v932_v47 = vadd.f32 %v931_v39, %v2630_v15  ;;  %v938_v31 = vadd.f32 %v937_v36, %v573_v61  ;;  %v916_v57 = vadd.f32 %v915_v48, %v2628_v21  ;;  %v922_v50 = vadd.f32 %v921_v45, %v2629_v13 }
 0x14d   :  { %v927_v32 = vrot.slane %v926_v14, 2  ;;  %v944_v18 = vadd.f32 %v943_v63, %v574_v42  ;;  %v950_v3 = vadd.f32 %v949_v9, %v575_v22  ;;  %v956_v35 = vadd.f32 %v955_v19, %v576_v20  ;;  %v1841_v63 = vld [vmem:[%s2598_s4] ss:$0 sm:$0xff] }
 0x14e   :  { %v933_v41 = vrot.slane %v932_v47, 2  ;;  %v939_v25 = vrot.slane %v938_v31, 2  ;;  %v917_v33 = vrot.slane %v916_v57, 1  ;;  %v923_v26 = vrot.slane %v922_v50, 1 }
 0x14f   :  { %v928_v16 = vadd.f32 %v927_v32, %v926_v14  ;;  %v945_v27 = vrot.slane %v944_v18, 2  ;;  %v951_v2 = vrot.slane %v950_v3, 2  ;;  %v957_v34 = vrot.slane %v956_v35, 2 }
 0x150   :  { %v934_v29 = vadd.f32 %v933_v41, %v932_v47  ;;  %v940_v55 = vadd.f32 %v939_v25, %v938_v31  ;;  %v918_v61 = vadd.f32 %v917_v33, %v916_v57  ;;  %v924_v40 = vadd.f32 %v923_v26, %v922_v50 }
 0x151   :  { %1305 = vmatmul.bf16.gmra.mxu1 %v1237_v38  ;;  %v929_v44 = vrot.slane %v928_v16, 1  ;;  %v946_v11 = vadd.f32 %v945_v27, %v944_v18  ;;  %v952_v53 = vadd.f32 %v951_v2, %v950_v3  ;;  %v958_v1 = vadd.f32 %v957_v34, %v956_v35 }
 0x152   :  { %v935_v49 = vrot.slane %v934_v29, 1  ;;  %v941_v12 = vrot.slane %v940_v55, 1  ;;  %v1017_v28 = vpack.c.bf16 %v918_v61, %v918_v61  ;;  %v1018_v51 = vpack.c.bf16 %v924_v40, %v924_v40 }
 0x153   :  { %v930_v59 = vadd.f32 %v929_v44, %v928_v16  ;;  %v947_v23 = vrot.slane %v946_v11, 1  ;;  %v953_v52 = vrot.slane %v952_v53, 1  ;;  %v959_v30 = vrot.slane %v958_v1, 1 }
 0x154   :  { %v936_v8 = vadd.f32 %v935_v49, %v934_v29  ;;  %v942_v5 = vadd.f32 %v941_v12, %v940_v55  ;;  %v1165_v6 = vunpack.c.l.b16 %v1017_v28  ;;  %v1166_v17 = vunpack.c.l.b16 %v1018_v51 }
 0x155   :  { %v1019_v4 = vpack.c.bf16 %v930_v59, %v930_v59  ;;  %v948_v42 = vadd.f32 %v947_v23, %v946_v11  ;;  %v954_v38 = vadd.f32 %v953_v52, %v952_v53  ;;  %v960_v7 = vadd.f32 %v959_v30, %v958_v1 }
 0x156   :  { %v1020_v62 = vpack.c.bf16 %v936_v8, %v936_v8  ;;  %v1021_v54 = vpack.c.bf16 %v942_v5, %v942_v5  ;;  %v1229_v58 = vsel %vm1173_vm0, %v1166_v17, %v1165_v6  ;;  %v1409_v26 = vlaneseq }
 0x157   :  { %v1167_v22 = vunpack.c.l.b16 %v1019_v4  ;;  %v1022_v60 = vpack.c.bf16 %v948_v42, %v948_v42  ;;  %v1023_v39 = vpack.c.bf16 %v954_v38, %v954_v38  ;;  %v1024_v37 = vpack.c.bf16 %v960_v7, %v960_v7 }
 0x158   :  { %v1168_v20 = vunpack.c.l.b16 %v1020_v62  ;;  %v1169_v24 = vunpack.c.l.b16 %v1021_v54  ;;  %v1410_v27 = vand.u32 127, %v1409_v26 }
 0x159   :  { %v1230_v43 = vsel %vm1175_vm1, %v1167_v22, %v1229_v58  ;;  %v1170_v46 = vunpack.c.l.b16 %v1022_v60  ;;  %v1171_v56 = vunpack.c.l.b16 %v1023_v39  ;;  %v1172_v14 = vunpack.c.l.b16 %v1024_v37 }
 0x15a   :  { %v1231_v36 = vsel %vm1177_vm2, %v1168_v20, %v1230_v43 }
 0x15b   :  { %v1232_v21 = vsel %vm1179_vm3, %v1169_v24, %v1231_v36 }
 0x15c   :  { %v1233_v48 = vsel %vm1181_vm4, %v1170_v46, %v1232_v21 }
 0x161   :  { %1310 = vmatmul.bf16.gmra.mxu1 %v1238_v10  ;;  %v1234_v10 = vsel %vm1183_vm5, %v1171_v56, %v1233_v48 }
 0x162   :  { %v1235_v13 = vsel %vm1185_vm6, %v1172_v14, %v1234_v10 }
 0x163   :  { %v1239_v45 = vpack.c.b16 %v1235_v13, %v2399_v0 }
 0x171   :  { %1315 = vmatmul.bf16.gmra.mxu1 %v1239_v45 }
 0x1be   :  { %v1301_v9 = vpop.f32.mrf.mxu1 }
 0x1bf   :  { %v1302_v15 = vadd.f32 %v1841_v63, %v1301_v9 }
 0x1c1   :  { %1321 = vmax.xlane.f32.xlu0 %v1302_v15 }
 0x1c6   :  { %v1303_v47 = vpop.f32.mrf.mxu1 }
 0x1c7   :  { %v2420_v19 = vadd.f32 %v1841_v63, %v1303_v47 }
 0x1c9   :  { %1323 = vmax.xlane.f32.xlu0 %v2420_v19 }
 0x1ce   :  { %v1306_v32 = vpop.f32.mrf.mxu1 }
 0x1cf   :  { %v2423_v31 = vadd.f32 %v1841_v63, %v1306_v32 }
 0x1d1   :  { %1325 = vmax.xlane.f32.xlu1 %v2423_v31 }
 0x1d6   :  { %v1308_v57 = vpop.f32.mrf.mxu1 }
 0x1d7   :  { %v1309_v0 = vadd.f32 %v1841_v63, %v1308_v57 }
 0x1d9   :  { %1327 = vmax.xlane.f32.xlu1 %v1309_v0 }
 0x1de   :  { %v1311_v50 = vpop.f32.mrf.mxu1 }
 0x1df   :  { %v2426_v18 = vadd.f32 %v1841_v63, %v1311_v50 }
 0x1e1   :  { %1329 = vmax.xlane.f32.xlu2 %v2426_v18 }
 0x1e6   :  { %v1313_v3 = vpop.f32.mrf.mxu1 }
 0x1e7   :  { %v2429_v41 = vadd.f32 %v1841_v63, %v1313_v3 }
 0x1e9   :  { %1331 = vmax.xlane.f32.xlu2 %v2429_v41 }
 0x1ee   :  { %v1316_v35 = vpop.f32.mrf.mxu1 }
 0x1ef   :  { %v2432_v16 = vadd.f32 %v1841_v63, %v1316_v35 }
 0x1f1   :  { %1333 = vmax.xlane.f32.xlu0 %v2432_v16 }
 0x1f6   :  { %v1318_v25 = vpop.f32.mrf.mxu1 }
 0x1f7   :  { %v2435_v33 = vadd.f32 %v1841_v63, %v1318_v25 }
 0x1f9   :  { %1335 = vmax.xlane.f32.xlu1 %v2435_v33 }
 0x234   :  { %v1322_v2 = vpop.xlane.xlu0 %1321 }
 0x235   :  { %vm1411_vm7 = vcmp.eq.f32.partialorder %v1302_v15, %v1322_v2  ;;  %v1337_v5 = vsub.f32 %v1302_v15, %v1322_v2 }
 0x236   :  { %v2438_v29 = vsel %vm1411_vm7, %v1410_v27, 128 }
 0x237   :  { %v1428_v34 = vshra.s32 %v2438_v29, 16  ;;  %v1345_v38 = vmul.f32 1.442695, %v1337_v5  ;;  %v1427_v3 = vand.u32 65535, %v2438_v29 }
 0x239   :  { %v2441_v44 = vcvt.s32.f32 %v1428_v34  ;;  %1842 = vpow2.f32 %v1345_v38  ;;  %v1429_v35 = vcvt.s32.f32 %v1427_v3 }
 0x23b   :  { %1431 = vmin.xlane.f32.xlu2 %v2441_v44 }
 0x23c   :  { %v1324_v55 = vpop.xlane.xlu0 %1323 }
 0x23d   :  { %vm1412_vm8 = vcmp.eq.f32.partialorder %v2420_v19, %v1324_v55  ;;  %v1338_v54 = vsub.f32 %v2420_v19, %v1324_v55 }
 0x23e   :  { %v2445_v61 = vsel %vm1412_vm8, %v1410_v27, 128 }
 0x23f   :  { %v1442_v40 = vshra.s32 %v2445_v61, 16  ;;  %v1347_v20 = vmul.f32 1.442695, %v1338_v54  ;;  %v1843_v43 = vpop.eup %1842  ;;  %v1441_v25 = vand.u32 65535, %v2445_v61 }
 0x241   :  { %v2448_v11 = vcvt.s32.f32 %v1442_v40  ;;  %v1443_v26 = vcvt.s32.f32 %v1441_v25 }
 0x243   :  { %1445 = vmin.xlane.f32.xlu0 %v2448_v11 }
 0x244   :  { %v1326_v53 = vpop.xlane.xlu1 %1325 }
 0x245   :  { %vm1413_vm9 = vcmp.eq.f32.partialorder %v2423_v31, %v1326_v53  ;;  %v1339_v24 = vsub.f32 %v2423_v31, %v1326_v53 }
 0x246   :  { %v2452_v49 = vsel %vm1413_vm9, %v1410_v27, 128 }
 0x247   :  { %v1456_v1 = vshra.s32 %v2452_v49, 16  ;;  %v1349_v21 = vmul.f32 1.442695, %v1339_v24  ;;  %v1455_v2 = vand.u32 65535, %v2452_v49 }
 0x249   :  { %v2455_v59 = vcvt.s32.f32 %v1456_v1  ;;  %v1457_v34 = vcvt.s32.f32 %v1455_v2 }
 0x24b   :  { %1459 = vmin.xlane.f32.xlu1 %v2455_v59 }
 0x24c   :  { %v1328_v12 = vpop.xlane.xlu1 %1327 }
 0x24d   :  { %vm1414_vm10 = vcmp.eq.f32.partialorder %v1309_v0, %v1328_v12  ;;  %v1340_v7 = vsub.f32 %v1309_v0, %v1328_v12 }
 0x24e   :  { %v2458_v28 = vsel %vm1414_vm10, %v1410_v27, 128 }
 0x24f   :  { %v1470_v51 = vshra.s32 %v2458_v28, 16  ;;  %v1351_v39 = vmul.f32 1.442695, %v1340_v7  ;;  %v1469_v55 = vand.u32 65535, %v2458_v28 }
 0x251   :  { %v2461_v23 = vcvt.s32.f32 %v1470_v51  ;;  %1844 = vpow2.f32 %v1351_v39  ;;  %v1471_v40 = vcvt.s32.f32 %v1469_v55 }
 0x252   :  { %1846 = vpow2.f32 %v1347_v20 }
 0x253   :  { %1473 = vmin.xlane.f32.xlu2 %v2461_v23  ;;  %1848 = vpow2.f32 %v1349_v21 }
 0x254   :  { %v1330_v52 = vpop.xlane.xlu2 %1329 }
 0x255   :  { %vm1415_vm11 = vcmp.eq.f32.partialorder %v2426_v18, %v1330_v52  ;;  %v1341_v14 = vsub.f32 %v2426_v18, %v1330_v52 }
 0x256   :  { %v2465_v8 = vsel %vm1415_vm11, %v1410_v27, 128 }
 0x257   :  { %v1484_v30 = vshra.s32 %v2465_v8, 16  ;;  %v1353_v13 = vmul.f32 1.442695, %v1341_v14  ;;  %v1845_v63 = vpop.eup %1844  ;;  %v1483_v53 = vand.u32 65535, %v2465_v8 }
 0x258   :  { %v1847_v9 = vpop.eup %1846 }
 0x259   :  { %v2468_v4 = vcvt.s32.f32 %v1484_v30  ;;  %v1849_v32 = vpop.eup %1848  ;;  %v1485_v1 = vcvt.s32.f32 %v1483_v53 }
 0x25b   :  { %1487 = vmin.xlane.f32.xlu0 %v2468_v4 }
 0x25c   :  { %v1332_v6 = vpop.xlane.xlu2 %1331 }
 0x25d   :  { %vm1416_vm12 = vcmp.eq.f32.partialorder %v2429_v41, %v1332_v6  ;;  %v1342_v15 = vsub.f32 %v2429_v41, %v1332_v6 }
 0x25e   :  { %v2472_v17 = vsel %vm1416_vm12, %v1410_v27, 128 }
 0x25f   :  { %v1498_v42 = vshra.s32 %v2472_v17, 16  ;;  %v1355_v19 = vmul.f32 1.442695, %v1342_v15  ;;  %v1497_v12 = vand.u32 65535, %v2472_v17 }
 0x261   :  { %v2475_v62 = vcvt.s32.f32 %v1498_v42  ;;  %v1499_v51 = vcvt.s32.f32 %v1497_v12 }
 0x263   :  { %1501 = vmin.xlane.f32.xlu1 %v2475_v62 }
 0x264   :  { %v1334_v22 = vpop.xlane.xlu0 %1333 }
 0x265   :  { %vm1417_vm13 = vcmp.eq.f32.partialorder %v2432_v16, %v1334_v22  ;;  %v1343_v46 = vsub.f32 %v2432_v16, %v1334_v22 }
 0x266   :  { %v2480_v58 = vsel %vm1417_vm13, %v1410_v27, 128 }
 0x267   :  { %v1512_v60 = vshra.s32 %v2480_v58, 16  ;;  %v1357_v10 = vmul.f32 1.442695, %v1343_v46  ;;  %v1511_v52 = vand.u32 65535, %v2480_v58 }
 0x269   :  { %v2483_v37 = vcvt.s32.f32 %v1512_v60  ;;  %1850 = vpow2.f32 %v1357_v10  ;;  %v1513_v5 = vcvt.s32.f32 %v1511_v52 }
 0x26a   :  { %1852 = vpow2.f32 %v1353_v13 }
 0x26b   :  { %1361 = vadd.xlane.f32.xlu1 %v1843_v43  ;;  %1515 = vmin.xlane.f32.xlu2 %v2483_v37  ;;  %1854 = vpow2.f32 %v1355_v19 }
 0x26c   :  { %v1336_v56 = vpop.xlane.xlu1 %1335 }
 0x26d   :  { %vm1418_vm14 = vcmp.eq.f32.partialorder %v2435_v33, %v1336_v56  ;;  %v1344_v47 = vsub.f32 %v2435_v33, %v1336_v56 }
 0x26e   :  { %v2490_v36 = vsel %vm1418_vm14, %v1410_v27, 128 }
 0x26f   :  { %v1526_v48 = vshra.s32 %v2490_v36, 16  ;;  %v1359_v31 = vmul.f32 1.442695, %v1344_v47  ;;  %v1851_v57 = vpop.eup %1850  ;;  %v1525_v6 = vand.u32 65535, %v2490_v36 }
 0x270   :  { %v1853_v0 = vpop.eup %1852 }
 0x271   :  { %v2493_v45 = vcvt.s32.f32 %v1526_v48  ;;  %1856 = vpow2.f32 %v1359_v31  ;;  %v1855_v50 = vpop.eup %1854  ;;  %v1527_v7 = vcvt.s32.f32 %v1525_v6 }
 0x273   :  { %1367 = vadd.xlane.f32.xlu1 %v1845_v63  ;;  %1529 = vmin.xlane.f32.xlu0 %v2493_v45 }
 0x274   :  { %1363 = vadd.xlane.f32.xlu2 %v1847_v9 }
 0x277   :  { %v1857_v18 = vpop.eup %1856 }
 0x27b   :  { %1365 = vadd.xlane.f32.xlu0 %v1849_v32  ;;  %1373 = vadd.xlane.f32.xlu1 %v1851_v57 }
 0x27c   :  { %1369 = vadd.xlane.f32.xlu2 %v1853_v0 }
 0x283   :  { %1371 = vadd.xlane.f32.xlu0 %v1855_v50 }
 0x284   :  { %1375 = vadd.xlane.f32.xlu2 %v1857_v18 }
 0x2ae   :  { %v2499_v41 = vpop.xlane.xlu2 %1431 }
 0x2af   :  { %vm1433_vm15 = vcmp.eq.f32.partialorder %v2441_v44, %v2499_v41 }
 0x2b0   :  { %v1434_v16 = vsel %vm1433_vm15, %v1429_v35, inf }
 0x2b1   :  { %1435 = vmin.xlane.f32.xlu0 %v1434_v16 }
 0x2b6   :  { %v2504_v33 = vpop.xlane.xlu0 %1445 }
 0x2b7   :  { %vm1447_vm0 = vcmp.eq.f32.partialorder %v2448_v11, %v2504_v33 }
 0x2b8   :  { %v1448_v27 = vsel %vm1447_vm0, %v1443_v26, inf }
 0x2b9   :  { %1449 = vmin.xlane.f32.xlu1 %v1448_v27 }
 0x2be   :  { %v2509_v29 = vpop.xlane.xlu1 %1459 }
 0x2bf   :  { %vm1461_vm1 = vcmp.eq.f32.partialorder %v2455_v59, %v2509_v29 }
 0x2c0   :  { %v1462_v44 = vsel %vm1461_vm1, %v1457_v34, inf }
 0x2c1   :  { %1463 = vmin.xlane.f32.xlu2 %v1462_v44  ;;  %v1438_v44 = vcvt.f32.s32 %v2499_v41 }
 0x2c6   :  { %v2514_v61 = vpop.xlane.xlu2 %1473 }
 0x2c7   :  { %vm1475_vm2 = vcmp.eq.f32.partialorder %v2461_v23, %v2514_v61 }
 0x2c8   :  { %v1476_v11 = vsel %vm1475_vm2, %v1471_v40, inf  ;;  %v1439_v40 = vshll.u32 %v1438_v44, 16 }
 0x2c9   :  { %1477 = vmin.xlane.f32.xlu0 %v1476_v11 }
 0x2ce   :  { %v2519_v49 = vpop.xlane.xlu0 %1487 }
 0x2cf   :  { %vm1489_vm3 = vcmp.eq.f32.partialorder %v2468_v4, %v2519_v49 }
 0x2d0   :  { %v1490_v59 = vsel %vm1489_vm3, %v1485_v1, inf  ;;  %v1452_v1 = vcvt.f32.s32 %v2504_v33 }
 0x2d1   :  { %1491 = vmin.xlane.f32.xlu1 %v1490_v59 }
 0x2d6   :  { %v2524_v28 = vpop.xlane.xlu1 %1501 }
 0x2d7   :  { %vm1503_vm4 = vcmp.eq.f32.partialorder %v2475_v62, %v2524_v28 }
 0x2d8   :  { %v1504_v23 = vsel %vm1503_vm4, %v1499_v51, inf  ;;  %v1453_v51 = vshll.u32 %v1452_v1, 16 }
 0x2d9   :  { %1505 = vmin.xlane.f32.xlu2 %v1504_v23 }
 0x2de   :  { %v1362_v8 = vpop.xlane.xlu1 %1361  ;;  %v2529_v30 = vpop.xlane.xlu2 %1515 }
 0x2df   :  { %1858 = vrcp.f32 %v1362_v8  ;;  %vm1517_vm5 = vcmp.eq.f32.partialorder %v2483_v37, %v2529_v30 }
 0x2e0   :  { %v1518_v4 = vsel %vm1517_vm5, %v1513_v5, inf }
 0x2e1   :  { %1519 = vmin.xlane.f32.xlu0 %v1518_v4 }
 0x2e5   :  { %v1859_v17 = vpop.eup %1858 }
 0x2e6   :  { %v1385_v42 = vmul.f32 %v1859_v17, %v1362_v8  ;;  %v1368_v38 = vpop.xlane.xlu1 %1367  ;;  %v2534_v62 = vpop.xlane.xlu0 %1529  ;;  %v1466_v8 = vcvt.f32.s32 %v2509_v29 }
 0x2e7   :  { %1860 = vrcp.f32 %v1368_v38  ;;  %v1364_v22 = vpop.xlane.xlu2 %1363  ;;  %vm1531_vm6 = vcmp.eq.f32.partialorder %v2493_v45, %v2534_v62 }
 0x2e8   :  { %v1393_v54 = vsub.f32 2.0, %v1385_v42  ;;  %1862 = vrcp.f32 %v1364_v22  ;;  %v1532_v58 = vsel %vm1531_vm6, %v1527_v7, inf  ;;  %v1467_v4 = vshll.u32 %v1466_v8, 16 }
 0x2e9   :  { %1533 = vmin.xlane.f32.xlu1 %v1532_v58 }
 0x2ea   :  { %v1401_v60 = vmul.f32 %v1859_v17, %v1393_v54  ;;  %v1480_v17 = vcvt.f32.s32 %v2514_v61  ;;  %v1494_v54 = vcvt.f32.s32 %v2519_v49 }
 0x2ec   :  { %1760 = vst [vmem:[%s2599_s5 + $0x40] sm:$0xff] %v1401_v60  ;;  %v1481_v7 = vshll.u32 %v1480_v17, 16 }
 0x2ed   :  { %v1861_v39 = vpop.eup %1860 }
 0x2ee   :  { %v1863_v20 = vpop.eup %1862  ;;  %v1388_v37 = vmul.f32 %v1861_v39, %v1368_v38  ;;  %v1374_v43 = vpop.xlane.xlu1 %1373 }
 0x2ef   :  { %v1366_v24 = vpop.xlane.xlu0 %1365  ;;  %v1386_v46 = vmul.f32 %v1863_v20, %v1364_v22  ;;  %v1370_v56 = vpop.xlane.xlu2 %1369  ;;  %1864 = vrcp.f32 %v1374_v43 }
 0x2f0   :  { %v1396_v14 = vsub.f32 2.0, %v1388_v37  ;;  %1866 = vrcp.f32 %v1370_v56  ;;  %v1508_v37 = vcvt.f32.s32 %v2524_v28 }
 0x2f1   :  { %v1394_v36 = vsub.f32 2.0, %v1386_v46  ;;  %1868 = vrcp.f32 %v1366_v24 }
 0x2f2   :  { %v1404_v21 = vmul.f32 %v1861_v39, %v1396_v14  ;;  %v1495_v39 = vshll.u32 %v1494_v54, 16  ;;  %v1509_v46 = vshll.u32 %v1508_v37, 16  ;;  %v1522_v14 = vcvt.f32.s32 %v2529_v30 }
 0x2f3   :  { %v1402_v48 = vmul.f32 %v1863_v20, %v1394_v36 }
 0x2f4   :  { %1763 = vst [vmem:[%s2599_s5 + $0x58] sm:$0xff] %v1404_v21 }
 0x2f5   :  { %v1865_v10 = vpop.eup %1864  ;;  %1761 = vst [vmem:[%s2599_s5 + $0x48] sm:$0xff] %v1402_v48  ;;  %v1523_v48 = vshll.u32 %v1522_v14, 16 }
 0x2f6   :  { %v1867_v13 = vpop.eup %1866  ;;  %v1391_v45 = vmul.f32 %v1865_v10, %v1374_v43 }
 0x2f7   :  { %v1372_v63 = vpop.xlane.xlu0 %1371  ;;  %v1869_v9 = vpop.eup %1868  ;;  %v1389_v15 = vmul.f32 %v1867_v13, %v1370_v56 }
 0x2f8   :  { %v1376_v47 = vpop.xlane.xlu2 %1375  ;;  %1870 = vrcp.f32 %v1372_v63  ;;  %v1399_v19 = vsub.f32 2.0, %v1391_v45  ;;  %v1387_v32 = vmul.f32 %v1869_v9, %v1366_v24 }
 0x2f9   :  { %1872 = vrcp.f32 %v1376_v47  ;;  %v1397_v31 = vsub.f32 2.0, %v1389_v15 }
 0x2fa   :  { %v1407_v57 = vmul.f32 %v1865_v10, %v1399_v19  ;;  %v1395_v0 = vsub.f32 2.0, %v1387_v32 }
 0x2fb   :  { %v1405_v50 = vmul.f32 %v1867_v13, %v1397_v31  ;;  %v1536_v13 = vcvt.f32.s32 %v2534_v62 }
 0x2fc   :  { %1766 = vst [vmem:[%s2599_s5 + $0x70] sm:$0xff] %v1407_v57  ;;  %v1403_v18 = vmul.f32 %v1869_v9, %v1395_v0 }
 0x2fd   :  { %1764 = vst [vmem:[%s2599_s5 + $0x60] sm:$0xff] %v1405_v50  ;;  %v1537_v9 = vshll.u32 %v1536_v13, 16 }
 0x2fe   :  { %v1871_v3 = vpop.eup %1870  ;;  %1762 = vst [vmem:[%s2599_s5 + $0x50] sm:$0xff] %v1403_v18 }
 0x2ff   :  { %v1873_v35 = vpop.eup %1872  ;;  %v1390_v16 = vmul.f32 %v1871_v3, %v1372_v63 }
 0x300   :  { %v1392_v25 = vmul.f32 %v1873_v35, %v1376_v47 }
 0x301   :  { %v1398_v26 = vsub.f32 2.0, %v1390_v16 }
 0x302   :  { %v1400_v27 = vsub.f32 2.0, %v1392_v25 }
 0x303   :  { %v1406_v2 = vmul.f32 %v1871_v3, %v1398_v26 }
 0x304   :  { %v1408_v34 = vmul.f32 %v1873_v35, %v1400_v27 }
 0x305   :  { %1765 = vst [vmem:[%s2599_s5 + $0x68] sm:$0xff] %v1406_v2 }
 0x306   :  { %1767 = vst [vmem:[%s2599_s5 + $0x78] sm:$0xff] %v1408_v34 }
 0x324   :  { %v1436_v55 = vpop.xlane.xlu0 %1435 }
 0x325   :  { %v1437_v11 = vcvt.f32.s32 %v1436_v55 }
 0x327   :  { %v1440_v53 = vadd.s32 %v1439_v40, %v1437_v11 }
 0x329   :  { %v1539_v59 = vcvt.s32.f32 %v1440_v53 }
 0x32b   :  { %1547 = vst [vmem:[%s2599_s5] sm:$0xff] %v1539_v59 }
 0x32c   :  { %v1450_v12 = vpop.xlane.xlu1 %1449 }
 0x32d   :  { %v1451_v23 = vcvt.f32.s32 %v1450_v12 }
 0x32f   :  { %v1454_v52 = vadd.s32 %v1453_v51, %v1451_v23 }
 0x331   :  { %v1540_v5 = vcvt.s32.f32 %v1454_v52 }
 0x333   :  { %1548 = vst [vmem:[%s2599_s5 + $0x8] sm:$0xff] %v1540_v5 }
 0x334   :  { %v1464_v41 = vpop.xlane.xlu2 %1463 }
 0x335   :  { %v1465_v6 = vcvt.f32.s32 %v1464_v41 }
 0x337   :  { %v1468_v33 = vadd.s32 %v1467_v4, %v1465_v6 }
 0x339   :  { %v1541_v42 = vcvt.s32.f32 %v1468_v33 }
 0x33b   :  { %1549 = vst [vmem:[%s2599_s5 + $0x10] sm:$0xff] %v1541_v42 }
 0x33c   :  { %v1478_v38 = vpop.xlane.xlu0 %1477 }
 0x33d   :  { %v1479_v22 = vcvt.f32.s32 %v1478_v38 }
 0x33f   :  { %v1482_v29 = vadd.s32 %v1481_v7, %v1479_v22 }
 0x341   :  { %v1542_v58 = vcvt.s32.f32 %v1482_v29 }
 0x343   :  { %1550 = vst [vmem:[%s2599_s5 + $0x18] sm:$0xff] %v1542_v58 }
 0x344   :  { %v1492_v60 = vpop.xlane.xlu1 %1491 }
 0x345   :  { %v1493_v20 = vcvt.f32.s32 %v1492_v60 }
 0x347   :  { %v1496_v61 = vadd.s32 %v1495_v39, %v1493_v20 }
 0x349   :  { %v1543_v43 = vcvt.s32.f32 %v1496_v61 }
 0x34b   :  { %1551 = vst [vmem:[%s2599_s5 + $0x20] sm:$0xff] %v1543_v43 }
 0x34c   :  { %v1506_v24 = vpop.xlane.xlu2 %1505 }
 0x34d   :  { %v1507_v56 = vcvt.f32.s32 %v1506_v24 }
 0x34f   :  { %v1510_v49 = vadd.s32 %v1509_v46, %v1507_v56 }
 0x351   :  { %v1544_v36 = vcvt.s32.f32 %v1510_v49 }
 0x353   :  { %1552 = vst [vmem:[%s2599_s5 + $0x28] sm:$0xff] %v1544_v36 }
 0x354   :  { %v1520_v21 = vpop.xlane.xlu0 %1519 }
 0x355   :  { %v1521_v10 = vcvt.f32.s32 %v1520_v21 }
 0x357   :  { %v1524_v28 = vadd.s32 %v1523_v48, %v1521_v10 }
 0x359   :  { %v1545_v45 = vcvt.s32.f32 %v1524_v28 }
 0x35b   :  { %1553 = vst [vmem:[%s2599_s5 + $0x30] sm:$0xff] %v1545_v45 }
 0x35c   :  { %v1534_v63 = vpop.xlane.xlu1 %1533 }
 0x35d   :  { %v1535_v15 = vcvt.f32.s32 %v1534_v63 }
 0x35f   :  { %v1538_v30 = vadd.s32 %v1537_v9, %v1535_v15 }
 0x361   :  { %v1546_v47 = vcvt.s32.f32 %v1538_v30 }
 0x363   :  { %1554 = vst [vmem:[%s2599_s5 + $0x38] sm:$0xff] %v1546_v47 }

</bundles_post_ra>
